<compile_context>
chip_gen: v7x
topology: tpu7x:2x2x1
jax: 0.10.0
libtpu: 0.0.40
codegen_flags: <defaults>
</compile_context>

<pallas_src>
import jax
import jax.numpy as jnp
from jax.experimental import pallas as pl
from jax.experimental.pallas import tpu as pltpu

NEG_SLOPE = 0.01  # default negative_slope of nn.LeakyReLU / F.leaky_relu


def _round_up(x, m):
    return (x + m - 1) // m * m


def _lrelu(x):
    return jnp.where(x >= 0, x, NEG_SLOPE * x)


# ----------------------------- fused Pallas kernel -------------------------- #

def fused_gcn_encoder_kernel(flags_ref,   # SMEM (L,) int32       (scalar prefetch)
                             a_ref,       # VMEM (Np, Np) bf16    A_hat (resident, 1 buffer)
                             w_ref,       # VMEM (1, Fp, Fp) bf16 layer weight (streamed)
                             b_ref,       # VMEM (1, 1, Fp) f32   layer bias (streamed)
                             x_hbm_ref,   # HBM  (Np, Fp) bf16    input features (pl.ANY)
                             o_ref,       # VMEM (Np, Fp) f32     output == f32 accumulator
                             h_ref):      # scratch (Np, Fp) bf16 resident activation H
    l = pl.program_id(0)
    last = pl.num_programs(0) - 1

    # Layer 0: DMA the (padded) input features straight from HBM into the
    # resident activation buffer; x occupies no pipeline VMEM afterwards.
    @pl.when(l == 0)
    def _():
        pltpu.sync_copy(x_hbm_ref, h_ref)

    is_gcn = flags_ref[l] != 0

    # GCNConv layer:  O = A_hat @ (H @ W)   (bf16 operands, f32 MXU accumulation)
    @pl.when(is_gcn)
    def _():
        hw = jnp.dot(h_ref[...], w_ref[0],
                     preferred_element_type=jnp.float32).astype(jnp.bfloat16)
        o_ref[...] = jnp.dot(a_ref[...], hw, preferred_element_type=jnp.float32)

    # Plain Linear layer:  O = H @ W
    @pl.when(jnp.logical_not(is_gcn))
    def _():
        o_ref[...] = jnp.dot(h_ref[...], w_ref[0],
                             preferred_element_type=jnp.float32)

    # bias + LeakyReLU in f32 on the VPU, reading from the f32 accumulator.
    # o_ref has a constant block index, so it is only written back to HBM after
    # the last grid step; intermediate contents never leave the chip.
    act = _lrelu(o_ref[...] + b_ref[0])

    @pl.when(l != last)
    def _():
        h_ref[...] = act.astype(jnp.bfloat16)   # running activation stays bf16

    @pl.when(l == last)
    def _():
        o_ref[...] = act                        # final activation leaves the chip


# ------------------------------- glue (JAX) -------------------------------- #

def gcn_norm_dense(edge_index, num_nodes):
    """Dense D^{-1/2} (A + I) D^{-1/2}, matching PyG gcn_norm defaults (f32).

    NOTE: uses the row-sum for both normalization factors, which matches PyG only
    for symmetric / undirected edge_index (the demo graph is undirected).
    """
    src, dst = edge_index[0], edge_index[1]
    adj = jnp.zeros((num_nodes, num_nodes), jnp.float32)
    adj = adj.at[dst, src].add(1.0)                       # message src -> dst
    adj = adj + jnp.eye(num_nodes, dtype=jnp.float32)     # add self loops
    deg = adj.sum(axis=1)                                 # degree incl. self loop
    dinv = jnp.where(deg > 0, jax.lax.rsqrt(deg), 0.0)
    return dinv[:, None] * adj * dinv[None, :]


def init_params(key, input_dim, output_dim, embedding_dim, n_layer=1):
    """Deterministic synthetic parameters. Weights stored as (in, out)."""
    def nxt():
        nonlocal key
        key, sub = jax.random.split(key)
        return sub

    p = {}
    # self.pre = nn.Linear(input_dim, embedding_dim)
    p["pre_w"] = jax.random.normal(nxt(), (input_dim, embedding_dim), jnp.float32) * 0.1
    p["pre_b"] = jax.random.normal(nxt(), (embedding_dim,), jnp.float32) * 0.1
    # GCNUnit: GCNConv(emb, emb) -> LeakyReLU -> GCNConv(emb, emb) -> LeakyReLU
    p["gcn"] = []
    for _ in range(n_layer):
        p["gcn"].append({
            "w1": jax.random.normal(nxt(), (embedding_dim, embedding_dim), jnp.float32) * 0.1,
            "b1": jnp.zeros((embedding_dim,), jnp.float32),   # GCNConv bias init = zeros
            "w2": jax.random.normal(nxt(), (embedding_dim, embedding_dim), jnp.float32) * 0.1,
            "b2": jnp.zeros((embedding_dim,), jnp.float32),
        })
    # linear_layers: nn.Linear(embedding_dim, output_dim) -> LeakyReLU
    p["out_w"] = jax.random.normal(nxt(), (embedding_dim, output_dim), jnp.float32) * 0.1
    p["out_b"] = jax.random.normal(nxt(), (output_dim,), jnp.float32) * 0.1
    return p


def _vmem_capacity_bytes():
    """Generation-aware physical VMEM (v5e/v6e: 128 MiB; v7x: 64 MiB per core)."""
    try:
        cap = getattr(pltpu.get_tpu_info(), "vmem_capacity_bytes", None)
        if cap:
            return int(cap)
    except Exception:
        pass
    return 64 * 1024 * 1024  # conservative default (v7x per-TensorCore)


def _build_fused_call(np_, fp, n_total, vmem_limit, single_buffer_residents):
    """Builds the pallas_call; optionally single-buffers the constant-index blocks."""

    def resident_spec(shape):
        index_map = lambda l, flags: (0,) * len(shape)
        if single_buffer_residents:
            try:
                # Constant-index blocks never change across the layer grid; one
                # buffer suffices — double buffering them only wastes VMEM.
                return pl.BlockSpec(shape, index_map, pipeline_mode=pl.Buffered(1))
            except (TypeError, AttributeError):
                pass
        return pl.BlockSpec(shape, index_map)

    grid_spec = pltpu.PrefetchScalarGridSpec(
        num_scalar_prefetch=1,
        grid=(n_total,),
        in_specs=[
            resident_spec((np_, np_)),                                   # A_hat (resident)
            pl.BlockSpec((1, fp, fp), lambda l, flags: (l, 0, 0)),       # W_l   (streamed)
            pl.BlockSpec((1, 1, fp), lambda l, flags: (l, 0, 0)),        # b_l   (streamed)
            pl.BlockSpec(memory_space=pl.ANY),                           # x     (stays in HBM)
        ],
        out_specs=resident_spec((np_, fp)),                              # output / f32 acc
        scratch_shapes=[pltpu.VMEM((np_, fp), jnp.bfloat16)],            # resident H
    )
    return pl.pallas_call(
        fused_gcn_encoder_kernel,
        out_shape=jax.ShapeDtypeStruct((np_, fp), jnp.float32),
        grid_spec=grid_spec,
        compiler_params=pltpu.CompilerParams(
            dimension_semantics=("arbitrary",),     # layers are strictly sequential
            vmem_limit_bytes=vmem_limit,
        ),
    )


def gcn_enhance_encoder(params, x, edge_index, batch):
    """Fused forward pass.  `batch` is carried for API parity (unused by GCNConv)."""
    del batch
    n, in_dim = x.shape
    emb = params["pre_w"].shape[1]
    out_dim = params["out_w"].shape[1]

    # One lane-dense feature width Fp for every layer; nodes pad to 128 so the
    # A_hat @ (H @ W) matmul (M = K = Np) runs full MXU tiles / unmasked stores.
    # (On v6e/v7x an embedding_dim giving Fp = 256 would fill the 256-wide MXU;
    #  that is a model hyper-parameter, not a kernel decision.)
    fp = _round_up(max(in_dim, emb, out_dim), 128)
    np_ = _round_up(n, 128)

    # Dense symmetric-normalized adjacency with self loops (PyG GCNConv defaults),
    # zero-padded (padded nodes are isolated) and stored bf16 for the MXU.
    # NOTE: padded rows acquire lrelu(bias) after Linear layers; this is harmless
    # only because A_hat's padded columns are zero and the final slice drops
    # those rows — do not pool over padded rows without masking.
    a_hat = gcn_norm_dense(edge_index, n)
    a_pad = jnp.zeros((np_, np_), jnp.float32).at[:n, :n].set(a_hat).astype(jnp.bfloat16)

    x_pad = jnp.zeros((np_, fp), jnp.float32).at[:n, :in_dim].set(x).astype(jnp.bfloat16)

    # Stack every layer's (zero-padded) weight / bias; flag the GCNConv layers.
    def pad_w(w):
        return jnp.zeros((fp, fp), jnp.float32).at[:w.shape[0], :w.shape[1]].set(w)

    def pad_b(b):
        return jnp.zeros((1, fp), jnp.float32).at[0, :b.shape[0]].set(b)

    w_list, b_list, flags = [pad_w(params["pre_w"])], [pad_b(params["pre_b"])], [0]
    for layer in params["gcn"]:
        w_list += [pad_w(layer["w1"]), pad_w(layer["w2"])]
        b_list += [pad_b(layer["b1"]), pad_b(layer["b2"])]
        flags += [1, 1]
    w_list.append(pad_w(params["out_w"]))
    b_list.append(pad_b(params["out_b"]))
    flags.append(0)

    n_total = len(w_list)
    w_stack = jnp.stack(w_list).astype(jnp.bfloat16)       # (L, Fp, Fp) bf16
    b_stack = jnp.stack(b_list)                            # (L, 1, Fp)  f32
    flags_arr = jnp.asarray(flags, jnp.int32)              # (L,) scalar prefetch

    # Explicit, generation-aware VMEM budget.
    cap = _vmem_capacity_bytes()
    est = (np_ * np_ * 2            # A_hat resident (bf16, single buffer)
           + 2 * fp * fp * 2        # W_l (bf16, double-buffered stream)
           + 2 * fp * 4             # b_l (f32, double-buffered stream)
           + np_ * fp * 4           # output == f32 accumulator (single buffer)
           + np_ * fp * 2           # resident activation H (bf16 scratch)
           + np_ * fp * 4)          # transient f32 H@W inside the GCN branch
    vmem_limit = int(max(16 << 20, min(cap - (2 << 20), est + (8 << 20))))
    # TODO(synk): if est approaches cap (A_hat no longer resident), switch to the
    # column-blocked A_hat streaming variant described at the top of the file.

    args = (flags_arr, a_pad, w_stack, b_stack, x_pad)
    try:
        out_pad = _build_fused_call(np_, fp, n_total, vmem_limit, True)(*args)
    except Exception:
        # Graceful degradation if this Pallas build rejects Buffered(1) on the
        # constant-index blocks: identical kernel, default double buffering.
        out_pad = _build_fused_call(np_, fp, n_total, vmem_limit, False)(*args)

    return out_pad[:n, :out_dim]


# ---------------------------------- main ------------------------------------ #

if __name__ == "__main__":
    N_NODES = 16
    INPUT_DIM = 4
    EMBEDDING_DIM = 32
    OUTPUT_DIM = 8
    N_LAYER = 1

    key = jax.random.PRNGKey(0)
    k_x, k_param = jax.random.split(key)

    # Node features (N, input_dim)
    x = jax.random.normal(k_x, (N_NODES, INPUT_DIM), jnp.float32)

    # Deterministic ring graph with chords, made undirected (both directions).
    src = jnp.arange(N_NODES, dtype=jnp.int32)
    dst_ring = (src + 1) % N_NODES
    dst_chord = (src + 3) % N_NODES
    srcs = jnp.concatenate([src, dst_ring, src, dst_chord])
    dsts = jnp.concatenate([dst_ring, src, dst_chord, src])
    edge_index = jnp.stack([srcs, dsts], axis=0)            # (2, E)

    batch = jnp.zeros((N_NODES,), jnp.int32)                # single graph

    params = init_params(k_param, INPUT_DIM, OUTPUT_DIM, EMBEDDING_DIM, N_LAYER)

    out = gcn_enhance_encoder(params, x, edge_index, batch)
    out = jax.block_until_ready(out)
    assert out.shape == (N_NODES, OUTPUT_DIM)
    print("KERNEL_OK")
</pallas_src>

<mosaic_0001>
module attributes {stable_mosaic.version = 11 : i64} {
  func.func @fused_gcn_encoder_kernel(%arg0: i32, %arg1: memref<4xi32, #tpu.memory_space<smem>>, %arg2: memref<128x128xbf16, #tpu.memory_space<vmem>>, %arg3: memref<1x128x128xbf16, #tpu.memory_space<vmem>>, %arg4: memref<1x1x128xf32, #tpu.memory_space<vmem>>, %arg5: memref<128x128xbf16, #tpu.memory_space<any>>, %arg6: memref<128x128xf32, #tpu.memory_space<vmem>>, %arg7: memref<128x128xbf16, #tpu.memory_space<vmem>>) attributes {dimension_semantics = [#tpu.dimension_semantics<arbitrary>], iteration_bounds = array<i64: 4>, scalar_prefetch = 1 : i64, scratch_operands = 1 : i64, tpu.core_type = #tpu.core_type<tc>, window_params = [{pipeline_mode = #tpu.pipeline_mode<synchronous>, transform_indices = @transform_0, window_bounds = array<i64: 128, 128>}, {transform_indices = @transform_1, window_bounds = array<i64: 1, 128, 128>}, {transform_indices = @transform_2, window_bounds = array<i64: 1, 1, 128>}, {}, {pipeline_mode = #tpu.pipeline_mode<synchronous>, transform_indices = @transform_4, window_bounds = array<i64: 128, 128>}]} {
    %c0_i32 = arith.constant 0 : i32
    %0 = arith.cmpi eq, %arg0, %c0_i32 : i32
    %1 = arith.extui %0 : i1 to i32
    %c0_i32_0 = arith.constant 0 : i32
    %2 = arith.cmpi ne, %1, %c0_i32_0 : i32
    scf.if %2 {
      "tpu.region"() ({
        %27 = tpu.sem_alloc : memref<!tpu.dma_semaphore, #tpu.memory_space<semaphore_mem>>
        tpu.enqueue_dma source(%arg5 : memref<128x128xbf16, #tpu.memory_space<any>>) target(%arg7 : memref<128x128xbf16, #tpu.memory_space<vmem>>) target_semaphore(%27 : memref<!tpu.dma_semaphore, #tpu.memory_space<semaphore_mem>>)
        tpu.wait_dma2 semaphore(%27 : memref<!tpu.dma_semaphore, #tpu.memory_space<semaphore_mem>>) src(%arg5 : memref<128x128xbf16, #tpu.memory_space<any>>) dst(%arg7 : memref<128x128xbf16, #tpu.memory_space<vmem>>)
        tpu.yield
      }) : () -> ()
    } else {
    }
    %3 = arith.index_cast %arg0 : i32 to index
    %4 = memref.load %arg1[%3] : memref<4xi32, #tpu.memory_space<smem>>
    %c0_i32_1 = arith.constant 0 : i32
    %5 = arith.cmpi ne, %4, %c0_i32_1 : i32
    %6 = arith.extui %5 : i1 to i32
    %c0_i32_2 = arith.constant 0 : i32
    %7 = arith.cmpi ne, %6, %c0_i32_2 : i32
    scf.if %7 {
      %c0_12 = arith.constant 0 : index
      %c0_13 = arith.constant 0 : index
      %27 = vector.load %arg7[%c0_12, %c0_13] : memref<128x128xbf16, #tpu.memory_space<vmem>>, vector<128x128xbf16>
      %c0_14 = arith.constant 0 : index
      %c0_15 = arith.constant 0 : index
      %c0_16 = arith.constant 0 : index
      %28 = vector.load %arg3[%c0_14, %c0_15, %c0_16] : memref<1x128x128xbf16, #tpu.memory_space<vmem>>, vector<1x128x128xbf16>
      %29 = vector.shape_cast %28 : vector<1x128x128xbf16> to vector<128x128xbf16>
      %cst_17 = arith.constant dense<0.000000e+00> : vector<128x128xf32>
      %30 = tpu.matmul %27, %29, %cst_17 {dimension_numbers = #tpu.dot_dimension_numbers<[1], [0], [0], [1], [0, 0, 1, 1], [], []>} : vector<128x128xbf16>, vector<128x128xbf16>, vector<128x128xf32> -> vector<128x128xf32>
      %31 = arith.truncf %30 : vector<128x128xf32> to vector<128x128xbf16>
      %c0_18 = arith.constant 0 : index
      %c0_19 = arith.constant 0 : index
      %32 = vector.load %arg2[%c0_18, %c0_19] : memref<128x128xbf16, #tpu.memory_space<vmem>>, vector<128x128xbf16>
      %cst_20 = arith.constant dense<0.000000e+00> : vector<128x128xf32>
      %33 = tpu.matmul %32, %31, %cst_20 {dimension_numbers = #tpu.dot_dimension_numbers<[1], [0], [0], [1], [0, 0, 1, 1], [], []>} : vector<128x128xbf16>, vector<128x128xbf16>, vector<128x128xf32> -> vector<128x128xf32>
      %c0_21 = arith.constant 0 : index
      %c0_22 = arith.constant 0 : index
      %34 = vector.load %arg6[%c0_21, %c0_22] : memref<128x128xf32, #tpu.memory_space<vmem>>, vector<128x128xf32>
      tpu.vector_store %arg6[%c0_21, %c0_22], %33 {strides = array<i32>} : memref<128x128xf32, #tpu.memory_space<vmem>>, vector<128x128xf32>,
    } else {
    }
    %true = arith.constant true
    %8 = arith.xori %5, %true : i1
    %9 = arith.extui %8 : i1 to i32
    %c0_i32_3 = arith.constant 0 : i32
    %10 = arith.cmpi ne, %9, %c0_i32_3 : i32
    scf.if %10 {
      %c0_12 = arith.constant 0 : index
      %c0_13 = arith.constant 0 : index
      %27 = vector.load %arg7[%c0_12, %c0_13] : memref<128x128xbf16, #tpu.memory_space<vmem>>, vector<128x128xbf16>
      %c0_14 = arith.constant 0 : index
      %c0_15 = arith.constant 0 : index
      %c0_16 = arith.constant 0 : index
      %28 = vector.load %arg3[%c0_14, %c0_15, %c0_16] : memref<1x128x128xbf16, #tpu.memory_space<vmem>>, vector<1x128x128xbf16>
      %29 = vector.shape_cast %28 : vector<1x128x128xbf16> to vector<128x128xbf16>
      %cst_17 = arith.constant dense<0.000000e+00> : vector<128x128xf32>
      %30 = tpu.matmul %27, %29, %cst_17 {dimension_numbers = #tpu.dot_dimension_numbers<[1], [0], [0], [1], [0, 0, 1, 1], [], []>} : vector<128x128xbf16>, vector<128x128xbf16>, vector<128x128xf32> -> vector<128x128xf32>
      %c0_18 = arith.constant 0 : index
      %c0_19 = arith.constant 0 : index
      %31 = vector.load %arg6[%c0_18, %c0_19] : memref<128x128xf32, #tpu.memory_space<vmem>>, vector<128x128xf32>
      tpu.vector_store %arg6[%c0_18, %c0_19], %30 {strides = array<i32>} : memref<128x128xf32, #tpu.memory_space<vmem>>, vector<128x128xf32>,
    } else {
    }
    %c0 = arith.constant 0 : index
    %c0_4 = arith.constant 0 : index
    %11 = vector.load %arg6[%c0, %c0_4] : memref<128x128xf32, #tpu.memory_space<vmem>>, vector<128x128xf32>
    %c0_5 = arith.constant 0 : index
    %c0_6 = arith.constant 0 : index
    %c0_7 = arith.constant 0 : index
    %12 = vector.load %arg4[%c0_5, %c0_6, %c0_7] : memref<1x1x128xf32, #tpu.memory_space<vmem>>, vector<1x1x128xf32>
    %13 = vector.shape_cast %12 : vector<1x1x128xf32> to vector<1x128xf32>
    %14 = vector.broadcast %13 : vector<1x128xf32> to vector<128x128xf32>
    %15 = arith.addf %11, %14 : vector<128x128xf32>
    %cst = arith.constant 0.000000e+00 : f32
    %16 = vector.broadcast %cst : f32 to vector<128x128xf32>
    %17 = arith.cmpf oge, %15, %16 : vector<128x128xf32>
    %cst_8 = arith.constant 0.00999999977 : f32
    %18 = vector.broadcast %cst_8 : f32 to vector<128x128xf32>
    %19 = arith.mulf %18, %15 : vector<128x128xf32>
    %20 = arith.select %17, %15, %19 : vector<128x128xi1>, vector<128x128xf32>
    %c3_i32 = arith.constant 3 : i32
    %21 = arith.cmpi ne, %arg0, %c3_i32 : i32
    %22 = arith.extui %21 : i1 to i32
    %c0_i32_9 = arith.constant 0 : i32
    %23 = arith.cmpi ne, %22, %c0_i32_9 : i32
    scf.if %23 {
      %27 = arith.truncf %20 : vector<128x128xf32> to vector<128x128xbf16>
      %c0_12 = arith.constant 0 : index
      %c0_13 = arith.constant 0 : index
      %28 = vector.load %arg7[%c0_12, %c0_13] : memref<128x128xbf16, #tpu.memory_space<vmem>>, vector<128x128xbf16>
      tpu.vector_store %arg7[%c0_12, %c0_13], %27 {strides = array<i32>} : memref<128x128xbf16, #tpu.memory_space<vmem>>, vector<128x128xbf16>,
    } else {
    }
    %c3_i32_10 = arith.constant 3 : i32
    %24 = arith.cmpi eq, %arg0, %c3_i32_10 : i32
    %25 = arith.extui %24 : i1 to i32
    %c0_i32_11 = arith.constant 0 : i32
    %26 = arith.cmpi ne, %25, %c0_i32_11 : i32
    scf.if %26 {
      %c0_12 = arith.constant 0 : index
      %c0_13 = arith.constant 0 : index
      %27 = vector.load %arg6[%c0_12, %c0_13] : memref<128x128xf32, #tpu.memory_space<vmem>>, vector<128x128xf32>
      tpu.vector_store %arg6[%c0_12, %c0_13], %20 {strides = array<i32>} : memref<128x128xf32, #tpu.memory_space<vmem>>, vector<128x128xf32>,
    } else {
    }
    return
  }
  func.func @transform_0(%arg0: i32, %arg1: memref<4xi32, #tpu.memory_space<smem>>) -> (i32, i32) {
    %c0_i32 = arith.constant 0 : i32
    %c0_i32_0 = arith.constant 0 : i32
    %c0_i32_1 = arith.constant 0 : i32
    return %c0_i32, %c0_i32_0 : i32, i32
  }
  func.func @transform_1(%arg0: i32, %arg1: memref<4xi32, #tpu.memory_space<smem>>) -> (i32, i32, i32) {
    %c0_i32 = arith.constant 0 : i32
    %c0_i32_0 = arith.constant 0 : i32
    %c0_i32_1 = arith.constant 0 : i32
    return %arg0, %c0_i32, %c0_i32_0 : i32, i32, i32
  }
  func.func @transform_2(%arg0: i32, %arg1: memref<4xi32, #tpu.memory_space<smem>>) -> (i32, i32, i32) {
    %c0_i32 = arith.constant 0 : i32
    %c0_i32_0 = arith.constant 0 : i32
    %c0_i32_1 = arith.constant 0 : i32
    return %arg0, %c0_i32, %c0_i32_0 : i32, i32, i32
  }
  func.func @transform_4(%arg0: i32, %arg1: memref<4xi32, #tpu.memory_space<smem>>) -> (i32, i32) {
    %c0_i32 = arith.constant 0 : i32
    %c0_i32_0 = arith.constant 0 : i32
    %c0_i32_1 = arith.constant 0 : i32
    return %c0_i32, %c0_i32_0 : i32, i32
  }
}

module attributes {stable_mosaic.version = 11 : i64} {
  func.func @fused_gcn_encoder_kernel(%arg0: i32, %arg1: memref<4xi32, #tpu.memory_space<smem>>, %arg2: memref<128x128xbf16, #tpu.memory_space<vmem>>, %arg3: memref<1x128x128xbf16, #tpu.memory_space<vmem>>, %arg4: memref<1x1x128xf32, #tpu.memory_space<vmem>>, %arg5: memref<128x128xbf16, #tpu.memory_space<any>>, %arg6: memref<128x128xf32, #tpu.memory_space<vmem>>, %arg7: memref<128x128xbf16, #tpu.memory_space<vmem>>) attributes {dimension_semantics = [#tpu.dimension_semantics<arbitrary>], iteration_bounds = array<i64: 4>, scalar_prefetch = 1 : i64, scratch_operands = 1 : i64, tpu.core_type = #tpu.core_type<tc>, window_params = [{pipeline_mode = #tpu.pipeline_mode<synchronous>, transform_indices = @transform_0, window_bounds = array<i64: 128, 128>}, {transform_indices = @transform_1, window_bounds = array<i64: 1, 128, 128>}, {transform_indices = @transform_2, window_bounds = array<i64: 1, 1, 128>}, {}, {pipeline_mode = #tpu.pipeline_mode<synchronous>, transform_indices = @transform_4, window_bounds = array<i64: 128, 128>}]} {
    %c0_i32 = arith.constant 0 : i32
    %0 = arith.cmpi eq, %arg0, %c0_i32 : i32
    %1 = arith.extui %0 : i1 to i32
    %c0_i32_0 = arith.constant 0 : i32
    %2 = arith.cmpi ne, %1, %c0_i32_0 : i32
    scf.if %2 {
      "tpu.region"() ({
        %27 = tpu.sem_alloc : memref<!tpu.dma_semaphore, #tpu.memory_space<semaphore_mem>>
        tpu.enqueue_dma source(%arg5 : memref<128x128xbf16, #tpu.memory_space<any>>) target(%arg7 : memref<128x128xbf16, #tpu.memory_space<vmem>>) target_semaphore(%27 : memref<!tpu.dma_semaphore, #tpu.memory_space<semaphore_mem>>)
        tpu.wait_dma2 semaphore(%27 : memref<!tpu.dma_semaphore, #tpu.memory_space<semaphore_mem>>) src(%arg5 : memref<128x128xbf16, #tpu.memory_space<any>>) dst(%arg7 : memref<128x128xbf16, #tpu.memory_space<vmem>>)
        tpu.yield
      }) : () -> ()
    } else {
    }
    %3 = arith.index_cast %arg0 : i32 to index
    %4 = memref.load %arg1[%3] : memref<4xi32, #tpu.memory_space<smem>>
    %c0_i32_1 = arith.constant 0 : i32
    %5 = arith.cmpi ne, %4, %c0_i32_1 : i32
    %6 = arith.extui %5 : i1 to i32
    %c0_i32_2 = arith.constant 0 : i32
    %7 = arith.cmpi ne, %6, %c0_i32_2 : i32
    scf.if %7 {
      %c0_12 = arith.constant 0 : index
      %c0_13 = arith.constant 0 : index
      %27 = vector.load %arg7[%c0_12, %c0_13] : memref<128x128xbf16, #tpu.memory_space<vmem>>, vector<128x128xbf16>
      %c0_14 = arith.constant 0 : index
      %c0_15 = arith.constant 0 : index
      %c0_16 = arith.constant 0 : index
      %28 = vector.load %arg3[%c0_14, %c0_15, %c0_16] : memref<1x128x128xbf16, #tpu.memory_space<vmem>>, vector<1x128x128xbf16>
      %29 = vector.shape_cast %28 : vector<1x128x128xbf16> to vector<128x128xbf16>
      %cst_17 = arith.constant dense<0.000000e+00> : vector<128x128xf32>
      %30 = tpu.matmul %27, %29, %cst_17 {dimension_numbers = #tpu.dot_dimension_numbers<[1], [0], [0], [1], [0, 0, 1, 1], [], []>} : vector<128x128xbf16>, vector<128x128xbf16>, vector<128x128xf32> -> vector<128x128xf32>
      %31 = arith.truncf %30 : vector<128x128xf32> to vector<128x128xbf16>
      %c0_18 = arith.constant 0 : index
      %c0_19 = arith.constant 0 : index
      %32 = vector.load %arg2[%c0_18, %c0_19] : memref<128x128xbf16, #tpu.memory_space<vmem>>, vector<128x128xbf16>
      %cst_20 = arith.constant dense<0.000000e+00> : vector<128x128xf32>
      %33 = tpu.matmul %32, %31, %cst_20 {dimension_numbers = #tpu.dot_dimension_numbers<[1], [0], [0], [1], [0, 0, 1, 1], [], []>} : vector<128x128xbf16>, vector<128x128xbf16>, vector<128x128xf32> -> vector<128x128xf32>
      %c0_21 = arith.constant 0 : index
      %c0_22 = arith.constant 0 : index
      %34 = vector.load %arg6[%c0_21, %c0_22] : memref<128x128xf32, #tpu.memory_space<vmem>>, vector<128x128xf32>
      tpu.vector_store %arg6[%c0_21, %c0_22], %33 {strides = array<i32>} : memref<128x128xf32, #tpu.memory_space<vmem>>, vector<128x128xf32>,
    } else {
    }
    %true = arith.constant true
    %8 = arith.xori %5, %true : i1
    %9 = arith.extui %8 : i1 to i32
    %c0_i32_3 = arith.constant 0 : i32
    %10 = arith.cmpi ne, %9, %c0_i32_3 : i32
    scf.if %10 {
      %c0_12 = arith.constant 0 : index
      %c0_13 = arith.constant 0 : index
      %27 = vector.load %arg7[%c0_12, %c0_13] : memref<128x128xbf16, #tpu.memory_space<vmem>>, vector<128x128xbf16>
      %c0_14 = arith.constant 0 : index
      %c0_15 = arith.constant 0 : index
      %c0_16 = arith.constant 0 : index
      %28 = vector.load %arg3[%c0_14, %c0_15, %c0_16] : memref<1x128x128xbf16, #tpu.memory_space<vmem>>, vector<1x128x128xbf16>
      %29 = vector.shape_cast %28 : vector<1x128x128xbf16> to vector<128x128xbf16>
      %cst_17 = arith.constant dense<0.000000e+00> : vector<128x128xf32>
      %30 = tpu.matmul %27, %29, %cst_17 {dimension_numbers = #tpu.dot_dimension_numbers<[1], [0], [0], [1], [0, 0, 1, 1], [], []>} : vector<128x128xbf16>, vector<128x128xbf16>, vector<128x128xf32> -> vector<128x128xf32>
      %c0_18 = arith.constant 0 : index
      %c0_19 = arith.constant 0 : index
      %31 = vector.load %arg6[%c0_18, %c0_19] : memref<128x128xf32, #tpu.memory_space<vmem>>, vector<128x128xf32>
      tpu.vector_store %arg6[%c0_18, %c0_19], %30 {strides = array<i32>} : memref<128x128xf32, #tpu.memory_space<vmem>>, vector<128x128xf32>,
    } else {
    }
    %c0 = arith.constant 0 : index
    %c0_4 = arith.constant 0 : index
    %11 = vector.load %arg6[%c0, %c0_4] : memref<128x128xf32, #tpu.memory_space<vmem>>, vector<128x128xf32>
    %c0_5 = arith.constant 0 : index
    %c0_6 = arith.constant 0 : index
    %c0_7 = arith.constant 0 : index
    %12 = vector.load %arg4[%c0_5, %c0_6, %c0_7] : memref<1x1x128xf32, #tpu.memory_space<vmem>>, vector<1x1x128xf32>
    %13 = vector.shape_cast %12 : vector<1x1x128xf32> to vector<1x128xf32>
    %14 = vector.broadcast %13 : vector<1x128xf32> to vector<128x128xf32>
    %15 = arith.addf %11, %14 : vector<128x128xf32>
    %cst = arith.constant 0.000000e+00 : f32
    %16 = vector.broadcast %cst : f32 to vector<128x128xf32>
    %17 = arith.cmpf oge, %15, %16 : vector<128x128xf32>
    %cst_8 = arith.constant 0.00999999977 : f32
    %18 = vector.broadcast %cst_8 : f32 to vector<128x128xf32>
    %19 = arith.mulf %18, %15 : vector<128x128xf32>
    %20 = arith.select %17, %15, %19 : vector<128x128xi1>, vector<128x128xf32>
    %c3_i32 = arith.constant 3 : i32
    %21 = arith.cmpi ne, %arg0, %c3_i32 : i32
    %22 = arith.extui %21 : i1 to i32
    %c0_i32_9 = arith.constant 0 : i32
    %23 = arith.cmpi ne, %22, %c0_i32_9 : i32
    scf.if %23 {
      %27 = arith.truncf %20 : vector<128x128xf32> to vector<128x128xbf16>
      %c0_12 = arith.constant 0 : index
      %c0_13 = arith.constant 0 : index
      %28 = vector.load %arg7[%c0_12, %c0_13] : memref<128x128xbf16, #tpu.memory_space<vmem>>, vector<128x128xbf16>
      tpu.vector_store %arg7[%c0_12, %c0_13], %27 {strides = array<i32>} : memref<128x128xbf16, #tpu.memory_space<vmem>>, vector<128x128xbf16>,
    } else {
    }
    %c3_i32_10 = arith.constant 3 : i32
    %24 = arith.cmpi eq, %arg0, %c3_i32_10 : i32
    %25 = arith.extui %24 : i1 to i32
    %c0_i32_11 = arith.constant 0 : i32
    %26 = arith.cmpi ne, %25, %c0_i32_11 : i32
    scf.if %26 {
      %c0_12 = arith.constant 0 : index
      %c0_13 = arith.constant 0 : index
      %27 = vector.load %arg6[%c0_12, %c0_13] : memref<128x128xf32, #tpu.memory_space<vmem>>, vector<128x128xf32>
      tpu.vector_store %arg6[%c0_12, %c0_13], %20 {strides = array<i32>} : memref<128x128xf32, #tpu.memory_space<vmem>>, vector<128x128xf32>,
    } else {
    }
    return
  }
  func.func @transform_0(%arg0: i32, %arg1: memref<4xi32, #tpu.memory_space<smem>>) -> (i32, i32) {
    %c0_i32 = arith.constant 0 : i32
    %c0_i32_0 = arith.constant 0 : i32
    %c0_i32_1 = arith.constant 0 : i32
    return %c0_i32, %c0_i32_0 : i32, i32
  }
  func.func @transform_1(%arg0: i32, %arg1: memref<4xi32, #tpu.memory_space<smem>>) -> (i32, i32, i32) {
    %c0_i32 = arith.constant 0 : i32
    %c0_i32_0 = arith.constant 0 : i32
    %c0_i32_1 = arith.constant 0 : i32
    return %arg0, %c0_i32, %c0_i32_0 : i32, i32, i32
  }
  func.func @transform_2(%arg0: i32, %arg1: memref<4xi32, #tpu.memory_space<smem>>) -> (i32, i32, i32) {
    %c0_i32 = arith.constant 0 : i32
    %c0_i32_0 = arith.constant 0 : i32
    %c0_i32_1 = arith.constant 0 : i32
    return %arg0, %c0_i32, %c0_i32_0 : i32, i32, i32
  }
  func.func @transform_4(%arg0: i32, %arg1: memref<4xi32, #tpu.memory_space<smem>>) -> (i32, i32) {
    %c0_i32 = arith.constant 0 : i32
    %c0_i32_0 = arith.constant 0 : i32
    %c0_i32_1 = arith.constant 0 : i32
    return %c0_i32, %c0_i32_0 : i32, i32
  }
}

</mosaic_0001>

<bundles_post_ra>
// kernel: tpu_custom_call.1
= control target key start
LH: loop header
LB: loop body
LE: loop exit
PB: predicated region body
PF: predicated region fallthrough
CT: control target
= control target key end

     0   :  { %s1730_s0 = inlined_call_operand.hbm [shape: s32[4], index: 0, kind: input, shape index: {}]   ;;  %s1731_s1 = inlined_call_operand.hbm [shape: bf16[128,128], index: 1, kind: input, shape index: {}]   ;;  %s1732_s2 = inlined_call_operand.hbm [shape: bf16[4,128,128], index: 2, kind: input, shape index: {}]   ;;  %s1733_s3 = inlined_call_operand.vmem [shape: f32[4,1,128], index: 3, kind: input, shape index: {}]   ;;  %s1734_s4 = inlined_call_operand.hbm [shape: bf16[128,128], index: 4, kind: input, shape index: {}]   ;;  %s1735_s5 = inlined_call_operand.hbm [shape: f32[128,128], index: 5, kind: output, shape index: {}]  }
   0x1   :  { %s1279_s20 = scalar_lea.hbm %s1730_s0, 16 }
   0x2   :  { %p1280_p0 = scmp.ne.s32.totalorder %s1730_s0, %s1279_s20  ;;  %p1283_p1 = scmp.lt.u32.totalorder %s1279_s20, %s1730_s0 }
   0x4   :  { %p1285_p2 = pnand %p1283_p1, %p1280_p0 }
   0x6   :  { %1288 = shalt.err (!%p1285_p2)  }
   0x7   :  { %s1443_s25 = smov [#allocation4]  }
   0x8   :  { %11 = dma.hbm_to_smem %s1730_s0, 16, %s1443_s25, [#allocation3] }
   0x9   :  { %1411 = dma.done.wait [#allocation3], 16 }
   0xa   :  { %1412 = vsyncadd [#allocation3], 4294967280 }
   0xb   :  { %13 = sfence }
   0xc   :  { %14 = vsyncpa [#allocation6], 0 }
   0xd   :  { %15 = vsyncpa [#allocation9], 0 }
   0xe   :  { %17 = vsyncpa [#allocation9 + $0x1], 0 }
   0xf   :  { %18 = vsyncpa [#allocation7], 0  ;;  %s1494_s28 = smov 0   ;;  %s1496_s29 = smov 0  }
  0x10   :  { %s1498_s30 = smov 0   ;;  %s1500_s6 = smov 0  }
  0x11 LB: > { %s1513_s0 = sadd.s32 4294967295, %s1441_s6   ;;  %p65_p3 = scmp.ne.s32.totalorder %s1433_s29, %s1429_s28  ;;  %s1441_s6 = sphi %s1500_s6, %s1751_s6   ;;  %s1437_s30 = sphi %s1498_s30, %s1750_s30   ;;  %s1433_s29 = sphi %s1496_s29, %s1749_s29   ;;  %s1429_s28 = sphi %s1494_s28, %s1748_s28  }
  0x12   : > { %p1736_p4 = scmp.eq.s32.totalorder %s1513_s0, 0  ;;  %p988_p5 = scmp.ge.s32.totalorder %s1441_s6, 1 }
  0x13   : > { %p123_p6 = scmp.lt.s32.totalorder %s1441_s6, 5  ;;  %s1444_s9 = smov [#allocation5]  }
  0x14   : > { %p1522_p8 = por %p1736_p4, %p65_p3  ;;  %s135_s10 = sshll.u32 %s1444_s9, 4  ;;  %s136_s10 = int_to_ptr.vmem [resolvable:$true] %s135_s10 }
  0x15   : > { %p1526_p9 = pnand %p988_p5, %p123_p6  ;;  %s1539_s12 = sadd.s32 1, %s1441_s6  }
  0x16   : > { %s1739_s7 = scalar_select %p1522_p8, 1, 0 }
  0x17   : > { %s1740_s8 = scalar_select %p1526_p9, 1, 0 }
  0x18   : > { %p1202_p10 = pneg %p1526_p9  ;;  %s52_s13 = sadd.s32 1, %s1437_s30 }
  0x19   : > { %s49_s14 = ssub.s32 %s1441_s6, %s1539_s12  ;;  %s1289_s17 = scalar_lea.hbm %s1731_s1, 1024 }
  0x1a   : > { %p1534_p11 = pnand %p1202_p10, %p1736_p4  ;;  %p1290_p12 = scmp.ne.s32.totalorder %s1731_s1, %s1289_s17 }
  0x1b   : > { %p1296_p2 = scmp.lt.u32.totalorder %s1289_s17, %s1731_s1 }
  0x1c   : > { %p1291_p13 = pneg %p1534_p11 }
  0x1e   : > { %p1292_p0 = pnand %p1291_p13, %p1290_p12 }
  0x20   : > { %p1293_p1 = pneg %p1292_p0 }
  0x22   : > { %p1298_p3 = pnand %p1296_p2, %p1293_p1 }
  0x24   : > { %1301 = shalt.err (!%p1298_p3)
}
  0x25   : > { %s1302_s22 = scalar_lea.vmem %s136_s10, 1024  ;;  %p1310_p7 = scmp.lt.s32.totalorder %s136_s10, %s136_s10 }
  0x26   : > { %p1303_p5 = scmp.ne.s32.totalorder %s136_s10, %s1302_s22  ;;  %p1311_p4 = scmp.lt.s32.totalorder %s1302_s22, %s1302_s22 }
  0x28   : > { %p1305_p6 = pnand %p1303_p5, %p1291_p13  ;;  %p1312_p8 = por %p1311_p4, %p1310_p7 }
  0x2a   : > { %p1306_p10 = pneg %p1305_p6 }
  0x2c   : > { %p1313_p9 = pnand %p1312_p8, %p1306_p10 }
  0x2e   : > { %1316 = shalt.err (!%p1313_p9)
}
  0x2f   : > { %s1445_s23 = smov 64   ;;  %s1446_s24 = smov 4  }
  0x30   : > { %1205 = dma.hbm_to_vmem [thread:$0]  (!%p1534_p11), %s1731_s1, 1024, %s136_s10, [#allocation6], %s1445_s23, %s1445_s23, %s1446_s24  }
  0x31   : > { %p50_p4 = scmp.eq.s32.totalorder %s49_s14, 0  ;;  %p59_p7 = scmp.ne.s32.totalorder %s1437_s30, %s1433_s29 }
  0x32   : > { %p60_p8 = scmp.eq.s32.totalorder %s1441_s6, 0  ;;  %p1211_p9 = scmp.lt.s32.totalorder %s1441_s6, 4 }
  0x33   : > { %s1568_s27 = scalar_select %p50_p4, %s1437_s30, %s52_s13  }
  0x34   : > { %p61_p12 = por %p60_p8, %p59_p7  ;;  %s149_s28 = sand.u32 1, %s1437_s30  }
  0x35   : > { %s991_s9 = sshll.u32 %s149_s28, 6  ;;  %s1031_s15 = sshll.u32 %s1441_s6, 10 }
  0x36   : > { %s1575_s11 = scalar_lea.hbm %s1732_s2, %s1031_s15  ;;  %s153_s10 = scalar_lea.vmem [#allocation8], %s991_s9 }
  0x37   : > { %s160_s14 = sshll.u32 %s153_s10, 4  ;;  %p1579_p11 = pnand %p1211_p9, %p61_p12  ;;  %s1577_s14 = int_to_ptr.vmem [resolvable:$true] %s160_s14 }
  0x38   : > { %s1583_s6 = scalar_lea.sflag [#allocation9], %s149_s28  ;;  %s1317_s18 = scalar_lea.hbm %s1575_s11, 1024 }
  0x39   : > { %p1318_p13 = scmp.ne.s32.totalorder %s1575_s11, %s1317_s18  ;;  %p1319_p0 = pneg %p1579_p11 }
  0x3a   : > { %s1322_s21 = scalar_lea.hbm %s1732_s2, 4096  ;;  %p1323_p3 = scmp.lt.u32.totalorder %s1575_s11, %s1732_s2 }
  0x3b   : > { %p1320_p1 = pnand %p1319_p0, %p1318_p13  ;;  %p1324_p5 = scmp.lt.u32.totalorder %s1322_s21, %s1317_s18 }
  0x3c   : > { %p1326_p10 = scmp.lt.u32.totalorder %s1317_s18, %s1575_s11 }
  0x3d   : > { %p1321_p2 = pneg %p1320_p1  ;;  %p1325_p6 = por %p1324_p5, %p1323_p3 }
  0x3f   : > { %p1327_p4 = por %p1326_p10, %p1325_p6 }
  0x41   : > { %p1328_p7 = pnand %p1327_p4, %p1321_p2 }
  0x43   : > { %1331 = shalt.err (!%p1328_p7)
}
  0x44   : > { %s1332_s26 = scalar_lea.vmem %s1577_s14, 1024  ;;  %s1447_s28 = smov [#allocation8]  }
  0x45   : > { %p1333_p8 = scmp.ne.s32.totalorder %s1577_s14, %s1332_s26  ;;  %s1337_s9 = sshll.u32 %s1447_s28, 4  ;;  %s1338_s9 = int_to_ptr.vmem [resolvable:$false] %s1337_s9 }
  0x46   : > { %s1339_s15 = scalar_lea.vmem %s1338_s9, 2048  ;;  %p1340_p13 = scmp.lt.s32.totalorder %s1577_s14, %s1338_s9 }
  0x47   : > { %p1335_p9 = pnand %p1333_p8, %p1319_p0  ;;  %p1341_p1 = scmp.lt.s32.totalorder %s1339_s15, %s1332_s26 }
  0x49   : > { %p1336_p12 = pneg %p1335_p9  ;;  %p1342_p3 = por %p1341_p1, %p1340_p13 }
  0x4b   : > { %p1343_p5 = pnand %p1342_p3, %p1336_p12 }
  0x4d   : > { %1346 = shalt.err (!%p1343_p5)
}
  0x4e   : > { %1209 = dma.hbm_to_vmem [thread:$0]  (!%p1579_p11), %s1575_s11, 1024, %s1577_s14, %s1583_s6, %s1445_s23, %s1445_s23, %s1446_s24  }
  0x4f   : > { %p1743_p0 = scmp.ne.s32.totalorder %s1740_s8, 0 }
  0x50   : > { %p1744_p2 = scmp.eq.s32.totalorder (!%p1743_p0), %s1513_s0, 0 }
  0x51   : > { %178 = sbr.rel (%p1743_p0) target bundleno = 969 (0x3c9), region = 32 }
  0x58   : > { %1414 = dma.done.wait (%p1744_p2), [#allocation6], 1024   ;;  %p1745_p6 = pmov %p1744_p2 }
  0x59   : > { %s184_s16 = sand.u32 1, %s1433_s29   ;;  %p1746_p10 = scmp.ne.s32.totalorder %s1739_s7, 0 }
  0x5a   : > { %1416 = vsyncadd (%p1745_p6), [#allocation6], 4294966272  ;;  %s996_s17 = sshll.u32 %s184_s16, 6  ;;  %s185_s10 = scalar_lea.sflag [#allocation9], %s184_s16 }
  0x5b   : > { %s1621_s13 = scalar_lea.vmem [#allocation8], %s996_s17 }
  0x5c   : > { %1418 = dma.done.wait (%p1746_p10), %s185_s10, 1024  }
  0x5d   : > { %1420 = vsyncadd (%p1746_p10), %s185_s10, 4294966272  ;;  %p209_p11 = scmp.lt.s32.totalorder %s1513_s0, 3  ;;  %p1747_p4 = scmp.ne.s32.totalorder %s1513_s0, 0 }
  0x5f   : > { %s1629_s8 = scalar_select %p209_p11, %s1513_s0, 3 }
  0x60   : > { %216 = sbr.rel (%p1747_p4) target bundleno = 121 (0x79), region = 44 }
  0x61   : > { %s211_s11 = scalar_lea.vmem %s1733_s3, %s1629_s8 }
  0x67   : > { %s1448_s14 = smov [#allocation2]   ;;  %s1347_s7 = scalar_lea.hbm %s1734_s4, 1024 }
  0x68   : > { %s224_s6 = sshll.u32 %s1448_s14, 4  ;;  %p1348_p7 = scmp.ne.s32.totalorder %s1734_s4, %s1347_s7  ;;  %s225_s6 = int_to_ptr.vmem [resolvable:$true] %s224_s6 }
  0x69   : > { %p1351_p8 = scmp.lt.u32.totalorder %s1347_s7, %s1734_s4 }
  0x6b   : > { %p1353_p9 = pnand %p1351_p8, %p1348_p7 }
  0x6d   : > { %1356 = shalt.err (!%p1353_p9)  }
  0x6e   : > { %s1357_s26 = scalar_lea.vmem %s225_s6, 1024  ;;  %p1362_p13 = scmp.lt.s32.totalorder %s225_s6, %s225_s6 }
  0x6f   : > { %p1358_p12 = scmp.ne.s32.totalorder %s225_s6, %s1357_s26  ;;  %p1363_p1 = scmp.lt.s32.totalorder %s1357_s26, %s1357_s26 }
  0x71   : > { %p1364_p3 = por %p1363_p1, %p1362_p13 }
  0x73   : > { %p1365_p5 = pnand %p1364_p3, %p1358_p12 }
  0x75   : > { %1368 = shalt.err (!%p1365_p5)  }
  0x76   : > { %227 = dma.hbm_to_vmem [thread:$0]  %s1734_s4, 1024, %s225_s6, [#allocation11] }
  0x77   : > { %1421 = dma.done.wait [#allocation11], 1024 }
  0x78   : > { %1422 = vsyncadd [#allocation11], 4294966272 }
  0x79 PF: > { %s1650_s15 = sld [smem:[#allocation4 + %s1513_s0]] }
  0x7f   : > { %p998_p0 = scmp.eq.s32.totalorder %s1650_s15, 0 }
  0x80   : > { %v1255_v0 = vld [vmem:[%s1621_s13] sm:$0xff] (!%p998_p0)   ;;  %v1256_v1 = vld [vmem:[%s1621_s13 + $0x8] sm:$0xff] (!%p998_p0)   ;;  %v1257_v2 = vld [vmem:[%s1621_s13 + $0x10] sm:$0xff] (!%p998_p0)  }
  0x81   : > { %236 = sbr.rel (%p998_p0) target bundleno = 650 (0x28a), region = 53  ;;  %1080 = vmatprep.subr.bf16.mxu0 (!%p998_p0), %v1255_v0  ;;  %v1258_v3 = vld [vmem:[%s1621_s13 + $0x18] sm:$0xff] (!%p998_p0)   ;;  %v237_v4 = vld [vmem:[#allocation2] sm:$0xff] (!%p998_p0)  ;;  %v1260_v6 = vld [vmem:[%s1621_s13 + $0x28] sm:$0xff] (!%p998_p0)  }
  0x82   : > { %1081 = vmatpush3.bf16.msra.mxu0 (!%p998_p0), %v1255_v0  ;;  %1096 = vmatprep.mubr.bf16.mxu0 (!%p998_p0), %v237_v4  ;;  %v1259_v5 = vld [vmem:[%s1621_s13 + $0x20] sm:$0xff] (!%p998_p0)   ;;  %v1261_v7 = vld [vmem:[%s1621_s13 + $0x30] sm:$0xff] (!%p998_p0)   ;;  %v1262_v8 = vld [vmem:[%s1621_s13 + $0x38] sm:$0xff] (!%p998_p0)  }
  0x83   : > { %1082 = vmatprep.subr.bf16.mxu0 (!%p998_p0), %v1256_v1  ;;  %v238_v9 = vld [vmem:[#allocation2 + $0x8] sm:$0xff] (!%p998_p0)  ;;  %v239_v10 = vld [vmem:[#allocation2 + $0x10] sm:$0xff] (!%p998_p0)  ;;  %v240_v11 = vld [vmem:[#allocation2 + $0x18] sm:$0xff] (!%p998_p0) }
  0x84   : > { %v241_v12 = vld [vmem:[#allocation2 + $0x20] sm:$0xff] (!%p998_p0)  ;;  %v242_v13 = vld [vmem:[#allocation2 + $0x28] sm:$0xff] (!%p998_p0)  ;;  %v243_v14 = vld [vmem:[#allocation2 + $0x30] sm:$0xff] (!%p998_p0) }
  0x85   : > { %v244_v15 = vld [vmem:[#allocation2 + $0x38] sm:$0xff] (!%p998_p0)  ;;  %v1263_v16 = vld [vmem:[#allocation5] sm:$0xff] (!%p998_p0)   ;;  %v1264_v41 = vld [vmem:[#allocation5 + $0x8] sm:$0xff] (!%p998_p0)  }
  0x86   : > { %1083 = vmatpush3.bf16.msra.mxu0 (!%p998_p0), %v1256_v1  ;;  %1128 = vmatprep.mubr.bf16.mxu1 (!%p998_p0), %v1263_v16  ;;  %v1265_v42 = vld [vmem:[#allocation5 + $0x10] sm:$0xff] (!%p998_p0)   ;;  %v1266_v43 = vld [vmem:[#allocation5 + $0x18] sm:$0xff] (!%p998_p0)   ;;  %v1267_v44 = vld [vmem:[#allocation5 + $0x20] sm:$0xff] (!%p998_p0)  }
  0x87   : > { %1084 = vmatprep.subr.bf16.mxu0 (!%p998_p0), %v1257_v2  ;;  %v1268_v45 = vld [vmem:[#allocation5 + $0x28] sm:$0xff] (!%p998_p0)   ;;  %v1269_v46 = vld [vmem:[#allocation5 + $0x30] sm:$0xff] (!%p998_p0)   ;;  %v1270_v47 = vld [vmem:[#allocation5 + $0x38] sm:$0xff] (!%p998_p0)  }
  0x8a   : > { %1085 = vmatpush3.bf16.msra.mxu0 %v1257_v2 }
  0x8b   : > { %1086 = vmatprep.subr.bf16.mxu0 %v1258_v3 }
  0x8e   : > { %1087 = vmatpush3.bf16.msra.mxu0 %v1258_v3 }
  0x8f   : > { %1088 = vmatprep.subr.bf16.mxu0 %v1259_v5 }
  0x92   : > { %1089 = vmatpush3.bf16.msra.mxu0 %v1259_v5 }
  0x93   : > { %1090 = vmatprep.subr.bf16.mxu0 %v1260_v6 }
  0x96   : > { %1091 = vmatpush3.bf16.msra.mxu0 %v1260_v6 }
  0x97   : > { %1092 = vmatprep.subr.bf16.mxu0 %v1261_v7 }
  0x9a   : > { %1093 = vmatpush3.bf16.msra.mxu0 %v1261_v7 }
  0x9b   : > { %1094 = vmatprep.subr.bf16.mxu0 %v1262_v8 }
  0x9e   : > { %1095 = vmatpush3.bf16.msra.mxu0 %v1262_v8 }
  0xa1   : > { %1097 = vmatmul.mubr.bf16.vlgmr.msra.gmra.mrb[0].mxu0 %v238_v9 }
  0xa2   : > { %1100 = vmatprep.mubr.bf16.mxu0 %v239_v10 }
  0xa9   : > { %1101 = vmatmul.mubr.bf16.gmra.mrb[4].mxu0 %v240_v11 }
  0xaa   : > { %1104 = vmatprep.mubr.bf16.mxu0 %v241_v12 }
  0xb1   : > { %1105 = vmatmul.mubr.bf16.gmra.mrb[8].mxu0 %v242_v13 }
  0xb2   : > { %1108 = vmatprep.mubr.bf16.mxu0 %v243_v14 }
  0xb9   : > { %1109 = vmatmul.mubr.bf16.gmra.mrb[12].mxu0 %v244_v15 }
 0x174   : > { %v1098_v17 = vpop.f32.mrb[0].mxu0 }
 0x175   : > { %v343_v18 = vpop.f32.mrb[1].mxu0 }
 0x176   : > { %v1099_v19 = vpop.f32.mrb[2].mxu0 }
 0x177   : > { %v407_v20 = vpack.c.bf16 %v1099_v19, %v1098_v17  ;;  %v346_v21 = vpop.f32.mrb[3].mxu0 }
 0x178   : > { %v406_v22 = vpack.c.bf16 %v346_v21, %v343_v18 }
 0x17a   : > { %1112 = vmatprep.subr.bf16.mxu1 %v406_v22 }
 0x17b   : > { %1113 = vmatpush3.bf16.msra.mxu1 %v406_v22 }
 0x17c   : > { %v1102_v23 = vpop.f32.mrb[4].mxu0  ;;  %1114 = vmatprep.subr.bf16.mxu1 %v407_v20 }
 0x17d   : > { %v359_v24 = vpop.f32.mrb[5].mxu0 }
 0x17e   : > { %v1103_v25 = vpop.f32.mrb[6].mxu0 }
 0x17f   : > { %v409_v26 = vpack.c.bf16 %v1103_v25, %v1102_v23  ;;  %v362_v27 = vpop.f32.mrb[7].mxu0  ;;  %1115 = vmatpush3.bf16.msra.mxu1 %v407_v20 }
 0x180   : > { %v408_v28 = vpack.c.bf16 %v362_v27, %v359_v24 }
 0x182   : > { %1116 = vmatprep.subr.bf16.mxu1 %v408_v28 }
 0x183   : > { %1117 = vmatpush3.bf16.msra.mxu1 %v408_v28 }
 0x184   : > { %v1106_v29 = vpop.f32.mrb[8].mxu0  ;;  %1118 = vmatprep.subr.bf16.mxu1 %v409_v26 }
 0x185   : > { %v375_v30 = vpop.f32.mrb[9].mxu0 }
 0x186   : > { %v1107_v31 = vpop.f32.mrb[10].mxu0 }
 0x187   : > { %v411_v32 = vpack.c.bf16 %v1107_v31, %v1106_v29  ;;  %v378_v33 = vpop.f32.mrb[11].mxu0  ;;  %1119 = vmatpush3.bf16.msra.mxu1 %v409_v26 }
 0x188   : > { %v410_v34 = vpack.c.bf16 %v378_v33, %v375_v30 }
 0x18a   : > { %1120 = vmatprep.subr.bf16.mxu1 %v410_v34 }
 0x18b   : > { %1121 = vmatpush3.bf16.msra.mxu1 %v410_v34 }
 0x18c   : > { %v1110_v35 = vpop.f32.mrb[12].mxu0  ;;  %1122 = vmatprep.subr.bf16.mxu1 %v411_v32 }
 0x18d   : > { %v391_v36 = vpop.f32.mrb[13].mxu0 }
 0x18e   : > { %v1111_v37 = vpop.f32.mrb[14].mxu0 }
 0x18f   : > { %v413_v38 = vpack.c.bf16 %v1111_v37, %v1110_v35  ;;  %v394_v39 = vpop.f32.mrb[15].mxu0  ;;  %1123 = vmatpush3.bf16.msra.mxu1 %v411_v32 }
 0x190   : > { %v412_v40 = vpack.c.bf16 %v394_v39, %v391_v36 }
 0x192   : > { %1124 = vmatprep.subr.bf16.mxu1 %v412_v40 }
 0x193   : > { %1125 = vmatpush3.bf16.msra.mxu1 %v412_v40 }
 0x194   : > { %1126 = vmatprep.subr.bf16.mxu1 %v413_v38 }
 0x197   : > { %1127 = vmatpush3.bf16.msra.mxu1 %v413_v38 }
 0x19a   : > { %1129 = vmatmul.mubr.bf16.vlgmr.msra.gmra.mrb[0].mxu1 %v1264_v41 }
 0x19b   : > { %1132 = vmatprep.mubr.bf16.mxu1 %v1265_v42 }
 0x1a2   : > { %1133 = vmatmul.mubr.bf16.gmra.mrb[4].mxu1 %v1266_v43 }
 0x1a3   : > { %1136 = vmatprep.mubr.bf16.mxu1 %v1267_v44 }
 0x1aa   : > { %1137 = vmatmul.mubr.bf16.gmra.mrb[8].mxu1 %v1268_v45 }
 0x1ab   : > { %1140 = vmatprep.mubr.bf16.mxu1 %v1269_v46 }
 0x1b2   : > { %1141 = vmatmul.mubr.bf16.gmra.mrb[12].mxu1 %v1270_v47 }
 0x26d   : > { %v1130_v48 = vpop.f32.mrb[0].mxu1 }
 0x26e   : > { %577 = vst [vmem:[#allocation10 + $0x10] sm:$0xff] %v1130_v48  ;;  %v512_v49 = vpop.f32.mrb[1].mxu1 }
 0x26f   : > { %575 = vst [vmem:[#allocation10] sm:$0xff] %v512_v49  ;;  %v1131_v50 = vpop.f32.mrb[2].mxu1 }
 0x270   : > { %578 = vst [vmem:[#allocation10 + $0x18] sm:$0xff] %v1131_v50  ;;  %v515_v51 = vpop.f32.mrb[3].mxu1 }
 0x271   : > { %576 = vst [vmem:[#allocation10 + $0x8] sm:$0xff] %v515_v51 }
 0x275   : > { %v1134_v52 = vpop.f32.mrb[4].mxu1 }
 0x276   : > { %581 = vst [vmem:[#allocation10 + $0x30] sm:$0xff] %v1134_v52  ;;  %v528_v53 = vpop.f32.mrb[5].mxu1 }
 0x277   : > { %579 = vst [vmem:[#allocation10 + $0x20] sm:$0xff] %v528_v53  ;;  %v1135_v54 = vpop.f32.mrb[6].mxu1 }
 0x278   : > { %582 = vst [vmem:[#allocation10 + $0x38] sm:$0xff] %v1135_v54  ;;  %v531_v55 = vpop.f32.mrb[7].mxu1 }
 0x279   : > { %580 = vst [vmem:[#allocation10 + $0x28] sm:$0xff] %v531_v55 }
 0x27d   : > { %v1138_v56 = vpop.f32.mrb[8].mxu1 }
 0x27e   : > { %585 = vst [vmem:[#allocation10 + $0x50] sm:$0xff] %v1138_v56  ;;  %v544_v57 = vpop.f32.mrb[9].mxu1 }
 0x27f   : > { %583 = vst [vmem:[#allocation10 + $0x40] sm:$0xff] %v544_v57  ;;  %v1139_v58 = vpop.f32.mrb[10].mxu1 }
 0x280   : > { %586 = vst [vmem:[#allocation10 + $0x58] sm:$0xff] %v1139_v58  ;;  %v547_v59 = vpop.f32.mrb[11].mxu1 }
 0x281   : > { %584 = vst [vmem:[#allocation10 + $0x48] sm:$0xff] %v547_v59 }
 0x285   : > { %v1142_v60 = vpop.f32.mrb[12].mxu1 }
 0x286   : > { %589 = vst [vmem:[#allocation10 + $0x70] sm:$0xff] %v1142_v60  ;;  %v560_v61 = vpop.f32.mrb[13].mxu1 }
 0x287   : > { %587 = vst [vmem:[#allocation10 + $0x60] sm:$0xff] %v560_v61  ;;  %v1143_v62 = vpop.f32.mrb[14].mxu1 }
 0x288   : > { %590 = vst [vmem:[#allocation10 + $0x78] sm:$0xff] %v1143_v62  ;;  %v563_v63 = vpop.f32.mrb[15].mxu1 }
 0x289   : > { %588 = vst [vmem:[#allocation10 + $0x68] sm:$0xff] %v563_v63 }
 0x28a PF: > { %p1015_p2 = scmp.ne.s32.totalorder %s1650_s15, 0 }
 0x28b   : > { %v1271_v0 = vld [vmem:[%s1621_s13] sm:$0xff] (!%p1015_p2)   ;;  %v1272_v1 = vld [vmem:[%s1621_s13 + $0x8] sm:$0xff] (!%p1015_p2)   ;;  %v1273_v2 = vld [vmem:[%s1621_s13 + $0x10] sm:$0xff] (!%p1015_p2)  }
 0x28c   : > { %594 = sbr.rel (%p1015_p2) target bundleno = 908 (0x38c), region = 57  ;;  %1144 = vmatprep.subr.bf16.mxu0 (!%p1015_p2), %v1271_v0  ;;  %1176 = vmatprep.subr.bf16.mxu1 (!%p1015_p2), %v1271_v0  ;;  %v1274_v3 = vld [vmem:[%s1621_s13 + $0x18] sm:$0xff] (!%p1015_p2)   ;;  %v595_v4 = vld [vmem:[#allocation2] sm:$0xff] (!%p1015_p2)  ;;  %v1276_v7 = vld [vmem:[%s1621_s13 + $0x28] sm:$0xff] (!%p1015_p2)  }
 0x28d   : > { %1145 = vmatpush3.bf16.msra.mxu0 (!%p1015_p2), %v1271_v0  ;;  %1184 = vmatpush3.bf16.msra.mxu1 (!%p1015_p2), %v1271_v0  ;;  %v599_v5 = vld [vmem:[#allocation2 + $0x20] sm:$0xff] (!%p1015_p2)  ;;  %v1277_v8 = vld [vmem:[%s1621_s13 + $0x30] sm:$0xff] (!%p1015_p2)   ;;  %v1278_v9 = vld [vmem:[%s1621_s13 + $0x38] sm:$0xff] (!%p1015_p2)  }
 0x28e   : > { %1146 = vmatprep.subr.bf16.mxu0 (!%p1015_p2), %v1272_v1  ;;  %1177 = vmatprep.subr.bf16.mxu1 (!%p1015_p2), %v1272_v1  ;;  %v1275_v6 = vld [vmem:[%s1621_s13 + $0x20] sm:$0xff] (!%p1015_p2)   ;;  %v596_v10 = vld [vmem:[#allocation2 + $0x8] sm:$0xff] (!%p1015_p2)  ;;  %v597_v12 = vld [vmem:[#allocation2 + $0x10] sm:$0xff] (!%p1015_p2) }
 0x28f   : > { %1160 = vmatprep.mubr.bf16.mxu0 (!%p1015_p2), %v595_v4  ;;  %1168 = vmatprep.mubr.bf16.mxu1 (!%p1015_p2), %v599_v5  ;;  %v600_v11 = vld [vmem:[#allocation2 + $0x28] sm:$0xff] (!%p1015_p2)  ;;  %v601_v13 = vld [vmem:[#allocation2 + $0x30] sm:$0xff] (!%p1015_p2)  ;;  %v598_v14 = vld [vmem:[#allocation2 + $0x18] sm:$0xff] (!%p1015_p2) }
 0x290   : > { %v602_v15 = vld [vmem:[#allocation2 + $0x38] sm:$0xff] (!%p1015_p2) }
 0x291   : > { %1147 = vmatpush3.bf16.msra.mxu0 (!%p1015_p2), %v1272_v1  ;;  %1185 = vmatpush3.bf16.msra.mxu1 (!%p1015_p2), %v1272_v1 }
 0x292   : > { %1148 = vmatprep.subr.bf16.mxu0 (!%p1015_p2), %v1273_v2  ;;  %1178 = vmatprep.subr.bf16.mxu1 (!%p1015_p2), %v1273_v2 }
 0x295   : > { %1149 = vmatpush3.bf16.msra.mxu0 %v1273_v2  ;;  %1186 = vmatpush3.bf16.msra.mxu1 %v1273_v2 }
 0x296   : > { %1150 = vmatprep.subr.bf16.mxu0 %v1274_v3  ;;  %1179 = vmatprep.subr.bf16.mxu1 %v1274_v3 }
 0x299   : > { %1151 = vmatpush3.bf16.msra.mxu0 %v1274_v3  ;;  %1187 = vmatpush3.bf16.msra.mxu1 %v1274_v3 }
 0x29a   : > { %1152 = vmatprep.subr.bf16.mxu0 %v1275_v6  ;;  %1180 = vmatprep.subr.bf16.mxu1 %v1275_v6 }
 0x29d   : > { %1153 = vmatpush3.bf16.msra.mxu0 %v1275_v6  ;;  %1188 = vmatpush3.bf16.msra.mxu1 %v1275_v6 }
 0x29e   : > { %1154 = vmatprep.subr.bf16.mxu0 %v1276_v7  ;;  %1181 = vmatprep.subr.bf16.mxu1 %v1276_v7 }
 0x2a1   : > { %1155 = vmatpush3.bf16.msra.mxu0 %v1276_v7  ;;  %1189 = vmatpush3.bf16.msra.mxu1 %v1276_v7 }
 0x2a2   : > { %1156 = vmatprep.subr.bf16.mxu0 %v1277_v8  ;;  %1182 = vmatprep.subr.bf16.mxu1 %v1277_v8 }
 0x2a5   : > { %1157 = vmatpush3.bf16.msra.mxu0 %v1277_v8  ;;  %1190 = vmatpush3.bf16.msra.mxu1 %v1277_v8 }
 0x2a6   : > { %1158 = vmatprep.subr.bf16.mxu0 %v1278_v9  ;;  %1183 = vmatprep.subr.bf16.mxu1 %v1278_v9 }
 0x2a9   : > { %1159 = vmatpush3.bf16.msra.mxu0 %v1278_v9  ;;  %1191 = vmatpush3.bf16.msra.mxu1 %v1278_v9 }
 0x2ac   : > { %1161 = vmatmul.mubr.bf16.vlgmr.msra.gmra.mrb[0].mxu0 %v596_v10  ;;  %1169 = vmatmul.mubr.bf16.vlgmr.msra.gmra.mrb[0].mxu1 %v600_v11 }
 0x2ad   : > { %1164 = vmatprep.mubr.bf16.mxu0 %v597_v12  ;;  %1172 = vmatprep.mubr.bf16.mxu1 %v601_v13 }
 0x2b4   : > { %1165 = vmatmul.mubr.bf16.gmra.mrb[4].mxu0 %v598_v14  ;;  %1173 = vmatmul.mubr.bf16.gmra.mrb[4].mxu1 %v602_v15 }
 0x37f   : > { %v1162_v16 = vpop.f32.mrb[0].mxu0  ;;  %v1170_v17 = vpop.f32.mrb[0].mxu1 }
 0x380   : > { %766 = vst [vmem:[#allocation10 + $0x10] sm:$0xff] %v1162_v16  ;;  %774 = vst [vmem:[#allocation10 + $0x50] sm:$0xff] %v1170_v17  ;;  %v701_v18 = vpop.f32.mrb[1].mxu0  ;;  %v733_v19 = vpop.f32.mrb[1].mxu1 }
 0x381   : > { %764 = vst [vmem:[#allocation10] sm:$0xff] %v701_v18  ;;  %772 = vst [vmem:[#allocation10 + $0x40] sm:$0xff] %v733_v19  ;;  %v1163_v20 = vpop.f32.mrb[2].mxu0  ;;  %v1171_v21 = vpop.f32.mrb[2].mxu1 }
 0x382   : > { %767 = vst [vmem:[#allocation10 + $0x18] sm:$0xff] %v1163_v20  ;;  %775 = vst [vmem:[#allocation10 + $0x58] sm:$0xff] %v1171_v21  ;;  %v704_v22 = vpop.f32.mrb[3].mxu0  ;;  %v736_v23 = vpop.f32.mrb[3].mxu1 }
 0x383   : > { %765 = vst [vmem:[#allocation10 + $0x8] sm:$0xff] %v704_v22  ;;  %773 = vst [vmem:[#allocation10 + $0x48] sm:$0xff] %v736_v23 }
 0x387   : > { %v1166_v24 = vpop.f32.mrb[4].mxu0  ;;  %v1174_v25 = vpop.f32.mrb[4].mxu1 }
 0x388   : > { %770 = vst [vmem:[#allocation10 + $0x30] sm:$0xff] %v1166_v24  ;;  %778 = vst [vmem:[#allocation10 + $0x70] sm:$0xff] %v1174_v25  ;;  %v717_v26 = vpop.f32.mrb[5].mxu0  ;;  %v749_v27 = vpop.f32.mrb[5].mxu1 }
 0x389   : > { %768 = vst [vmem:[#allocation10 + $0x20] sm:$0xff] %v717_v26  ;;  %776 = vst [vmem:[#allocation10 + $0x60] sm:$0xff] %v749_v27  ;;  %v1167_v28 = vpop.f32.mrb[6].mxu0  ;;  %v1175_v29 = vpop.f32.mrb[6].mxu1 }
 0x38a   : > { %771 = vst [vmem:[#allocation10 + $0x38] sm:$0xff] %v1167_v28  ;;  %779 = vst [vmem:[#allocation10 + $0x78] sm:$0xff] %v1175_v29  ;;  %v720_v30 = vpop.f32.mrb[7].mxu0  ;;  %v752_v31 = vpop.f32.mrb[7].mxu1 }
 0x38b   : > { %769 = vst [vmem:[#allocation10 + $0x28] sm:$0xff] %v720_v30  ;;  %777 = vst [vmem:[#allocation10 + $0x68] sm:$0xff] %v752_v31 }
 0x38c PF: > { %v780_v32 = vld [vmem:[#allocation10] sm:$0xff]  ;;  %v781_v33 = vld [vmem:[#allocation10 + $0x8] sm:$0xff]  ;;  %v782_v34 = vld [vmem:[#allocation10 + $0x10] sm:$0xff]  ;;  %p1025_p6 = scmp.eq.s32.totalorder %s1513_s0, 3 }
 0x38d   : > { %v783_v35 = vld [vmem:[#allocation10 + $0x18] sm:$0xff]  ;;  %v788_v40 = vld [vmem:[#allocation10 + $0x40] sm:$0xff]  ;;  %v789_v41 = vld [vmem:[#allocation10 + $0x48] sm:$0xff] }
 0x38e   : > { %v790_v42 = vld [vmem:[#allocation10 + $0x50] sm:$0xff]  ;;  %v791_v43 = vld [vmem:[#allocation10 + $0x58] sm:$0xff] }
 0x38f   : > { %v786_v38 = vld [vmem:[#allocation10 + $0x30] sm:$0xff]  ;;  %v1024_v45 = vld [vmem:[%s211_s11] ss:$0 sm:$0xff] }
 0x390   : > { %v784_v36 = vld [vmem:[#allocation10 + $0x20] sm:$0xff]  ;;  %v794_v47 = vld [vmem:[#allocation10 + $0x70] sm:$0xff]  ;;  %v803_v49 = vadd.f32 %v1024_v45, %v780_v32  ;;  %v804_v50 = vadd.f32 %v1024_v45, %v781_v33  ;;  %v805_v51 = vadd.f32 %v1024_v45, %v782_v34  ;;  %v806_v52 = vadd.f32 %v1024_v45, %v783_v35 }
 0x391   : > { %v787_v39 = vld [vmem:[#allocation10 + $0x38] sm:$0xff]  ;;  %v792_v44 = vld [vmem:[#allocation10 + $0x60] sm:$0xff]  ;;  %v807_v53 = vadd.f32 %v1024_v45, %v784_v36  ;;  %v809_v55 = vadd.f32 %v1024_v45, %v786_v38  ;;  %v811_v57 = vadd.f32 %v1024_v45, %v788_v40  ;;  %v812_v58 = vadd.f32 %v1024_v45, %v789_v41 }
 0x392   : > { %v785_v37 = vld [vmem:[#allocation10 + $0x28] sm:$0xff]  ;;  %v795_v48 = vld [vmem:[#allocation10 + $0x78] sm:$0xff]  ;;  %v810_v56 = vadd.f32 %v1024_v45, %v787_v39  ;;  %v813_v59 = vadd.f32 %v1024_v45, %v790_v42  ;;  %v814_v60 = vadd.f32 %v1024_v45, %v791_v43  ;;  %v815_v61 = vadd.f32 %v1024_v45, %v792_v44 }
 0x393   : > { %v793_v46 = vld [vmem:[#allocation10 + $0x68] sm:$0xff]  ;;  %v808_v54 = vadd.f32 %v1024_v45, %v785_v37  ;;  %v817_v63 = vadd.f32 %v1024_v45, %v794_v47  ;;  %v818_v0 = vadd.f32 %v1024_v45, %v795_v48  ;;  %vm819_vm0 = vcmp.ge.f32.partialorder %v803_v49, 0.0 }
 0x394   : > { %v816_v62 = vadd.f32 %v1024_v45, %v793_v46  ;;  %vm820_vm1 = vcmp.ge.f32.partialorder %v804_v50, 0.0  ;;  %vm821_vm2 = vcmp.ge.f32.partialorder %v805_v51, 0.0  ;;  %vm822_vm3 = vcmp.ge.f32.partialorder %v806_v52, 0.0 }
 0x395   : > { %vm823_vm4 = vcmp.ge.f32.partialorder %v807_v53, 0.0  ;;  %vm824_vm5 = vcmp.ge.f32.partialorder %v808_v54, 0.0  ;;  %vm825_vm6 = vcmp.ge.f32.partialorder %v809_v55, 0.0  ;;  %vm826_vm7 = vcmp.ge.f32.partialorder %v810_v56, 0.0 }
 0x396   : > { %vm827_vm8 = vcmp.ge.f32.partialorder %v811_v57, 0.0  ;;  %vm828_vm9 = vcmp.ge.f32.partialorder %v812_v58, 0.0  ;;  %vm829_vm10 = vcmp.ge.f32.partialorder %v813_v59, 0.0  ;;  %vm830_vm11 = vcmp.ge.f32.partialorder %v814_v60, 0.0 }
 0x397   : > { %vm831_vm12 = vcmp.ge.f32.partialorder %v815_v61, 0.0  ;;  %vm832_vm13 = vcmp.ge.f32.partialorder %v816_v62, 0.0  ;;  %vm833_vm14 = vcmp.ge.f32.partialorder %v817_v63, 0.0  ;;  %vm834_vm15 = vcmp.ge.f32.partialorder %v818_v0, 0.0 }
 0x398   : > { %v835_v1 = vmul.f32 0.01, %v803_v49  ;;  %v836_v2 = vmul.f32 0.01, %v804_v50  ;;  %v837_v3 = vmul.f32 0.01, %v805_v51 }
 0x399   : > { %v838_v4 = vmul.f32 0.01, %v806_v52  ;;  %v839_v5 = vmul.f32 0.01, %v807_v53  ;;  %v840_v6 = vmul.f32 0.01, %v808_v54 }
 0x39a   : > { %v841_v7 = vmul.f32 0.01, %v809_v55  ;;  %v842_v8 = vmul.f32 0.01, %v810_v56  ;;  %v843_v9 = vmul.f32 0.01, %v811_v57  ;;  %v851_v10 = vsel %vm819_vm0, %v803_v49, %v835_v1 }
 0x39b   : > { %v844_v11 = vmul.f32 0.01, %v812_v58  ;;  %v845_v12 = vmul.f32 0.01, %v813_v59  ;;  %v846_v13 = vmul.f32 0.01, %v814_v60  ;;  %v852_v14 = vsel %vm820_vm1, %v804_v50, %v836_v2 }
 0x39c   : > { %v847_v15 = vmul.f32 0.01, %v815_v61  ;;  %v848_v16 = vmul.f32 0.01, %v816_v62  ;;  %v849_v17 = vmul.f32 0.01, %v817_v63  ;;  %v853_v18 = vsel %vm821_vm2, %v805_v51, %v837_v3 }
 0x39d   : > { %v850_v19 = vmul.f32 0.01, %v818_v0  ;;  %v854_v20 = vsel %vm822_vm3, %v806_v52, %v838_v4  ;;  %v855_v21 = vsel %vm823_vm4, %v807_v53, %v839_v5  ;;  %v856_v22 = vsel %vm824_vm5, %v808_v54, %v840_v6  ;;  %870 = sbr.rel (%p1025_p6) target bundleno = 934 (0x3a6), region = 61 }
 0x39e   : > { %v857_v23 = vsel %vm825_vm6, %v809_v55, %v841_v7  ;;  %v858_v24 = vsel %vm826_vm7, %v810_v56, %v842_v8  ;;  %v859_v25 = vsel %vm827_vm8, %v811_v57, %v843_v9  ;;  %v860_v26 = vsel %vm828_vm9, %v812_v58, %v844_v11 }
 0x39f   : > { %v861_v27 = vsel %vm829_vm10, %v813_v59, %v845_v12  ;;  %v862_v28 = vsel %vm830_vm11, %v814_v60, %v846_v13  ;;  %v863_v29 = vsel %vm831_vm12, %v815_v61, %v847_v15  ;;  %v864_v30 = vsel %vm832_vm13, %v816_v62, %v848_v16 }
 0x3a0   : > { %v865_v31 = vsel %vm833_vm14, %v817_v63, %v849_v17  ;;  %v866_v32 = vsel %vm834_vm15, %v818_v0, %v850_v19  ;;  %v871_v33 = vpack.c.bf16 (!%p1025_p6), %v852_v14, %v851_v10  ;;  %v872_v34 = vpack.c.bf16 (!%p1025_p6), %v854_v20, %v853_v18 }
 0x3a1   : > { %v873_v35 = vpack.c.bf16 (!%p1025_p6), %v856_v22, %v855_v21  ;;  %v874_v36 = vpack.c.bf16 (!%p1025_p6), %v858_v24, %v857_v23  ;;  %v875_v37 = vpack.c.bf16 (!%p1025_p6), %v860_v26, %v859_v25  ;;  %v876_v38 = vpack.c.bf16 (!%p1025_p6), %v862_v28, %v861_v27 }
 0x3a2   : > { %v877_v39 = vpack.c.bf16 (!%p1025_p6), %v864_v30, %v863_v29  ;;  %v878_v40 = vpack.c.bf16 (!%p1025_p6), %v866_v32, %v865_v31  ;;  %879 = vst [vmem:[#allocation2] sm:$0xff] (!%p1025_p6), %v871_v33  ;;  %880 = vst [vmem:[#allocation2 + $0x8] sm:$0xff] (!%p1025_p6), %v872_v34 }
 0x3a3   : > { %881 = vst [vmem:[#allocation2 + $0x10] sm:$0xff] (!%p1025_p6), %v873_v35  ;;  %882 = vst [vmem:[#allocation2 + $0x18] sm:$0xff] (!%p1025_p6), %v874_v36 }
 0x3a4   : > { %883 = vst [vmem:[#allocation2 + $0x20] sm:$0xff] %v875_v37  ;;  %884 = vst [vmem:[#allocation2 + $0x28] sm:$0xff] %v876_v38 }
 0x3a5   : > { %885 = vst [vmem:[#allocation2 + $0x30] sm:$0xff] %v877_v39  ;;  %886 = vst [vmem:[#allocation2 + $0x38] sm:$0xff] %v878_v40 }
 0x3a6 PF: > { %p1026_p10 = scmp.ne.s32.totalorder %s1513_s0, 3 }
 0x3a7   : > { %891 = vst [vmem:[#allocation10] sm:$0xff] (!%p1026_p10), %v851_v10  ;;  %892 = vst [vmem:[#allocation10 + $0x8] sm:$0xff] (!%p1026_p10), %v852_v14 }
 0x3a8   : > { %890 = sbr.rel (%p1026_p10) target bundleno = 943 (0x3af), region = 65  ;;  %893 = vst [vmem:[#allocation10 + $0x10] sm:$0xff] (!%p1026_p10), %v853_v18  ;;  %894 = vst [vmem:[#allocation10 + $0x18] sm:$0xff] (!%p1026_p10), %v854_v20 }
 0x3a9   : > { %895 = vst [vmem:[#allocation10 + $0x20] sm:$0xff] (!%p1026_p10), %v855_v21  ;;  %896 = vst [vmem:[#allocation10 + $0x28] sm:$0xff] (!%p1026_p10), %v856_v22 }
 0x3aa   : > { %897 = vst [vmem:[#allocation10 + $0x30] sm:$0xff] (!%p1026_p10), %v857_v23  ;;  %898 = vst [vmem:[#allocation10 + $0x38] sm:$0xff] (!%p1026_p10), %v858_v24 }
 0x3ab   : > { %899 = vst [vmem:[#allocation10 + $0x40] sm:$0xff] (!%p1026_p10), %v859_v25  ;;  %900 = vst [vmem:[#allocation10 + $0x48] sm:$0xff] (!%p1026_p10), %v860_v26 }
 0x3ac   : > { %901 = vst [vmem:[#allocation10 + $0x50] sm:$0xff] (!%p1026_p10), %v861_v27  ;;  %902 = vst [vmem:[#allocation10 + $0x58] sm:$0xff] (!%p1026_p10), %v862_v28 }
 0x3ad   : > { %903 = vst [vmem:[#allocation10 + $0x60] sm:$0xff] (!%p1026_p10), %v863_v29  ;;  %904 = vst [vmem:[#allocation10 + $0x68] sm:$0xff] (!%p1026_p10), %v864_v30 }
 0x3ae   : > { %905 = vst [vmem:[#allocation10 + $0x70] sm:$0xff] (!%p1026_p10), %v865_v31  ;;  %906 = vst [vmem:[#allocation10 + $0x78] sm:$0xff] (!%p1026_p10), %v866_v32 }
 0x3af PF: > { %s1449_s10 = smov [#allocation10]  }
 0x3b0   : > { %s913_s13 = sshll.u32 %s1449_s10, 4  ;;  %s914_s13 = int_to_ptr.vmem [resolvable:$true] %s913_s13 }
 0x3b1   : > { %s1369_s8 = scalar_lea.vmem %s914_s13, 2048  ;;  %p1376_p8 = scmp.lt.s32.totalorder %s914_s13, %s914_s13 }
 0x3b2   : > { %p1370_p11 = scmp.ne.s32.totalorder %s914_s13, %s1369_s8  ;;  %p1377_p9 = scmp.lt.s32.totalorder %s1369_s8, %s1369_s8 }
 0x3b4   : > { %p1371_p4 = pnand %p1370_p11, %p1025_p6  ;;  %p1378_p12 = por %p1377_p9, %p1376_p8 }
 0x3b6   : > { %p1372_p7 = pneg %p1371_p4 }
 0x3b8   : > { %p1379_p13 = pnand %p1378_p12, %p1372_p7 }
 0x3ba   : > { %1382 = shalt.err (!%p1379_p13)
}
 0x3bb   : > { %s1383_s11 = scalar_lea.hbm %s1735_s5, 2048 }
 0x3bc   : > { %p1384_p1 = scmp.ne.s32.totalorder %s1735_s5, %s1383_s11  ;;  %p1389_p0 = scmp.lt.u32.totalorder %s1383_s11, %s1735_s5 }
 0x3be   : > { %p1385_p3 = pnand %p1384_p1, %p1025_p6 }
 0x3c0   : > { %p1386_p5 = pneg %p1385_p3 }
 0x3c2   : > { %p1391_p2 = pnand %p1389_p0, %p1386_p5 }
 0x3c4   : > { %1394 = shalt.err (!%p1391_p2)
}
 0x3c5   : > { %s1450_s7 = smov 128   ;;  %s1451_s20 = smov 8  }
 0x3c6   : > { %1199 = dma.vmem_to_hbm [thread:$0]  (%p1025_p6), %s914_s13, 2048, %s1735_s5, [#allocation7], %s1450_s7, %s1450_s7, %s1451_s20  }
 0x3c7   : > { %1424 = dma.done.wait (%p1025_p6), [#allocation7], 2048  }
 0x3c8   : > { %1426 = vsyncadd (%p1025_p6), [#allocation7], 4294965248 }
 0x3c9 PF: > { %p21_p10 = scmp.ge.s32.totalorder %s1539_s12, 6   ;;  %s1748_s28 = smov %s1433_s29 }
 0x3ca   : > { %s1749_s29 = smov %s1437_s30  ;;  %s1750_s30 = smov %s1568_s27 }
 0x3cb   : > { %s1751_s6 = smov %s1539_s12  ;;  %23 = sbr.rel (!%p21_p10) target bundleno = 17 (0x11), region = 102 }
 0x3d2   :  { %929 = vsyncpa [#allocation6], 1 }
 0x3d3   :  { %931 = vsyncpa [#allocation6 + $0x1], 1 }
 0x3d4   :  { %932 = vsyncpa [#allocation9], 1 }
 0x3d5   :  { %934 = vsyncpa [#allocation9 + $0x1], 1 }
 0x3d6   :  { %935 = vsyncpa [#allocation7], 1 }
 0x3d7   :  { %937 = vsyncpa [#allocation7 + $0x1], 1 }

// kernel: tpu_custom_call.1
= control target key start
LH: loop header
LB: loop body
LE: loop exit
PB: predicated region body
PF: predicated region fallthrough
CT: control target
= control target key end

     0   :  { %s1730_s0 = inlined_call_operand.hbm [shape: s32[4], index: 0, kind: input, shape index: {}]   ;;  %s1731_s1 = inlined_call_operand.hbm [shape: bf16[128,128], index: 1, kind: input, shape index: {}]   ;;  %s1732_s2 = inlined_call_operand.hbm [shape: bf16[4,128,128], index: 2, kind: input, shape index: {}]   ;;  %s1733_s3 = inlined_call_operand.vmem [shape: f32[4,1,128], index: 3, kind: input, shape index: {}]   ;;  %s1734_s4 = inlined_call_operand.hbm [shape: bf16[128,128], index: 4, kind: input, shape index: {}]   ;;  %s1735_s5 = inlined_call_operand.hbm [shape: f32[128,128], index: 5, kind: output, shape index: {}]  }
   0x1   :  { %s1279_s20 = scalar_lea.hbm %s1730_s0, 16 }
   0x2   :  { %p1280_p0 = scmp.ne.s32.totalorder %s1730_s0, %s1279_s20  ;;  %p1283_p1 = scmp.lt.u32.totalorder %s1279_s20, %s1730_s0 }
   0x4   :  { %p1285_p2 = pnand %p1283_p1, %p1280_p0 }
   0x6   :  { %1288 = shalt.err (!%p1285_p2)  }
   0x7   :  { %s1443_s25 = smov [#allocation4]  }
   0x8   :  { %11 = dma.hbm_to_smem %s1730_s0, 16, %s1443_s25, [#allocation3] }
   0x9   :  { %1411 = dma.done.wait [#allocation3], 16 }
   0xa   :  { %1412 = vsyncadd [#allocation3], 4294967280 }
   0xb   :  { %13 = sfence }
   0xc   :  { %14 = vsyncpa [#allocation6], 0 }
   0xd   :  { %15 = vsyncpa [#allocation9], 0 }
   0xe   :  { %17 = vsyncpa [#allocation9 + $0x1], 0 }
   0xf   :  { %18 = vsyncpa [#allocation7], 0  ;;  %s1494_s28 = smov 0   ;;  %s1496_s29 = smov 0  }
  0x10   :  { %s1498_s30 = smov 0   ;;  %s1500_s6 = smov 0  }
  0x11 LB: > { %s1513_s0 = sadd.s32 4294967295, %s1441_s6   ;;  %p65_p3 = scmp.ne.s32.totalorder %s1433_s29, %s1429_s28  ;;  %s1441_s6 = sphi %s1500_s6, %s1751_s6   ;;  %s1437_s30 = sphi %s1498_s30, %s1750_s30   ;;  %s1433_s29 = sphi %s1496_s29, %s1749_s29   ;;  %s1429_s28 = sphi %s1494_s28, %s1748_s28  }
  0x12   : > { %p1736_p4 = scmp.eq.s32.totalorder %s1513_s0, 0  ;;  %p988_p5 = scmp.ge.s32.totalorder %s1441_s6, 1 }
  0x13   : > { %p123_p6 = scmp.lt.s32.totalorder %s1441_s6, 5  ;;  %s1444_s9 = smov [#allocation5]  }
  0x14   : > { %p1522_p8 = por %p1736_p4, %p65_p3  ;;  %s135_s10 = sshll.u32 %s1444_s9, 4  ;;  %s136_s10 = int_to_ptr.vmem [resolvable:$true] %s135_s10 }
  0x15   : > { %p1526_p9 = pnand %p988_p5, %p123_p6  ;;  %s1539_s12 = sadd.s32 1, %s1441_s6  }
  0x16   : > { %s1739_s7 = scalar_select %p1522_p8, 1, 0 }
  0x17   : > { %s1740_s8 = scalar_select %p1526_p9, 1, 0 }
  0x18   : > { %p1202_p10 = pneg %p1526_p9  ;;  %s52_s13 = sadd.s32 1, %s1437_s30 }
  0x19   : > { %s49_s14 = ssub.s32 %s1441_s6, %s1539_s12  ;;  %s1289_s17 = scalar_lea.hbm %s1731_s1, 1024 }
  0x1a   : > { %p1534_p11 = pnand %p1202_p10, %p1736_p4  ;;  %p1290_p12 = scmp.ne.s32.totalorder %s1731_s1, %s1289_s17 }
  0x1b   : > { %p1296_p2 = scmp.lt.u32.totalorder %s1289_s17, %s1731_s1 }
  0x1c   : > { %p1291_p13 = pneg %p1534_p11 }
  0x1e   : > { %p1292_p0 = pnand %p1291_p13, %p1290_p12 }
  0x20   : > { %p1293_p1 = pneg %p1292_p0 }
  0x22   : > { %p1298_p3 = pnand %p1296_p2, %p1293_p1 }
  0x24   : > { %1301 = shalt.err (!%p1298_p3)
}
  0x25   : > { %s1302_s22 = scalar_lea.vmem %s136_s10, 1024  ;;  %p1310_p7 = scmp.lt.s32.totalorder %s136_s10, %s136_s10 }
  0x26   : > { %p1303_p5 = scmp.ne.s32.totalorder %s136_s10, %s1302_s22  ;;  %p1311_p4 = scmp.lt.s32.totalorder %s1302_s22, %s1302_s22 }
  0x28   : > { %p1305_p6 = pnand %p1303_p5, %p1291_p13  ;;  %p1312_p8 = por %p1311_p4, %p1310_p7 }
  0x2a   : > { %p1306_p10 = pneg %p1305_p6 }
  0x2c   : > { %p1313_p9 = pnand %p1312_p8, %p1306_p10 }
  0x2e   : > { %1316 = shalt.err (!%p1313_p9)
}
  0x2f   : > { %s1445_s23 = smov 64   ;;  %s1446_s24 = smov 4  }
  0x30   : > { %1205 = dma.hbm_to_vmem [thread:$0]  (!%p1534_p11), %s1731_s1, 1024, %s136_s10, [#allocation6], %s1445_s23, %s1445_s23, %s1446_s24  }
  0x31   : > { %p50_p4 = scmp.eq.s32.totalorder %s49_s14, 0  ;;  %p59_p7 = scmp.ne.s32.totalorder %s1437_s30, %s1433_s29 }
  0x32   : > { %p60_p8 = scmp.eq.s32.totalorder %s1441_s6, 0  ;;  %p1211_p9 = scmp.lt.s32.totalorder %s1441_s6, 4 }
  0x33   : > { %s1568_s27 = scalar_select %p50_p4, %s1437_s30, %s52_s13  }
  0x34   : > { %p61_p12 = por %p60_p8, %p59_p7  ;;  %s149_s28 = sand.u32 1, %s1437_s30  }
  0x35   : > { %s991_s9 = sshll.u32 %s149_s28, 6  ;;  %s1031_s15 = sshll.u32 %s1441_s6, 10 }
  0x36   : > { %s1575_s11 = scalar_lea.hbm %s1732_s2, %s1031_s15  ;;  %s153_s10 = scalar_lea.vmem [#allocation8], %s991_s9 }
  0x37   : > { %s160_s14 = sshll.u32 %s153_s10, 4  ;;  %p1579_p11 = pnand %p1211_p9, %p61_p12  ;;  %s1577_s14 = int_to_ptr.vmem [resolvable:$true] %s160_s14 }
  0x38   : > { %s1583_s6 = scalar_lea.sflag [#allocation9], %s149_s28  ;;  %s1317_s18 = scalar_lea.hbm %s1575_s11, 1024 }
  0x39   : > { %p1318_p13 = scmp.ne.s32.totalorder %s1575_s11, %s1317_s18  ;;  %p1319_p0 = pneg %p1579_p11 }
  0x3a   : > { %s1322_s21 = scalar_lea.hbm %s1732_s2, 4096  ;;  %p1323_p3 = scmp.lt.u32.totalorder %s1575_s11, %s1732_s2 }
  0x3b   : > { %p1320_p1 = pnand %p1319_p0, %p1318_p13  ;;  %p1324_p5 = scmp.lt.u32.totalorder %s1322_s21, %s1317_s18 }
  0x3c   : > { %p1326_p10 = scmp.lt.u32.totalorder %s1317_s18, %s1575_s11 }
  0x3d   : > { %p1321_p2 = pneg %p1320_p1  ;;  %p1325_p6 = por %p1324_p5, %p1323_p3 }
  0x3f   : > { %p1327_p4 = por %p1326_p10, %p1325_p6 }
  0x41   : > { %p1328_p7 = pnand %p1327_p4, %p1321_p2 }
  0x43   : > { %1331 = shalt.err (!%p1328_p7)
}
  0x44   : > { %s1332_s26 = scalar_lea.vmem %s1577_s14, 1024  ;;  %s1447_s28 = smov [#allocation8]  }
  0x45   : > { %p1333_p8 = scmp.ne.s32.totalorder %s1577_s14, %s1332_s26  ;;  %s1337_s9 = sshll.u32 %s1447_s28, 4  ;;  %s1338_s9 = int_to_ptr.vmem [resolvable:$false] %s1337_s9 }
  0x46   : > { %s1339_s15 = scalar_lea.vmem %s1338_s9, 2048  ;;  %p1340_p13 = scmp.lt.s32.totalorder %s1577_s14, %s1338_s9 }
  0x47   : > { %p1335_p9 = pnand %p1333_p8, %p1319_p0  ;;  %p1341_p1 = scmp.lt.s32.totalorder %s1339_s15, %s1332_s26 }
  0x49   : > { %p1336_p12 = pneg %p1335_p9  ;;  %p1342_p3 = por %p1341_p1, %p1340_p13 }
  0x4b   : > { %p1343_p5 = pnand %p1342_p3, %p1336_p12 }
  0x4d   : > { %1346 = shalt.err (!%p1343_p5)
}
  0x4e   : > { %1209 = dma.hbm_to_vmem [thread:$0]  (!%p1579_p11), %s1575_s11, 1024, %s1577_s14, %s1583_s6, %s1445_s23, %s1445_s23, %s1446_s24  }
  0x4f   : > { %p1743_p0 = scmp.ne.s32.totalorder %s1740_s8, 0 }
  0x50   : > { %p1744_p2 = scmp.eq.s32.totalorder (!%p1743_p0), %s1513_s0, 0 }
  0x51   : > { %178 = sbr.rel (%p1743_p0) target bundleno = 969 (0x3c9), region = 32 }
  0x58   : > { %1414 = dma.done.wait (%p1744_p2), [#allocation6], 1024   ;;  %p1745_p6 = pmov %p1744_p2 }
  0x59   : > { %s184_s16 = sand.u32 1, %s1433_s29   ;;  %p1746_p10 = scmp.ne.s32.totalorder %s1739_s7, 0 }
  0x5a   : > { %1416 = vsyncadd (%p1745_p6), [#allocation6], 4294966272  ;;  %s996_s17 = sshll.u32 %s184_s16, 6  ;;  %s185_s10 = scalar_lea.sflag [#allocation9], %s184_s16 }
  0x5b   : > { %s1621_s13 = scalar_lea.vmem [#allocation8], %s996_s17 }
  0x5c   : > { %1418 = dma.done.wait (%p1746_p10), %s185_s10, 1024  }
  0x5d   : > { %1420 = vsyncadd (%p1746_p10), %s185_s10, 4294966272  ;;  %p209_p11 = scmp.lt.s32.totalorder %s1513_s0, 3  ;;  %p1747_p4 = scmp.ne.s32.totalorder %s1513_s0, 0 }
  0x5f   : > { %s1629_s8 = scalar_select %p209_p11, %s1513_s0, 3 }
  0x60   : > { %216 = sbr.rel (%p1747_p4) target bundleno = 121 (0x79), region = 44 }
  0x61   : > { %s211_s11 = scalar_lea.vmem %s1733_s3, %s1629_s8 }
  0x67   : > { %s1448_s14 = smov [#allocation2]   ;;  %s1347_s7 = scalar_lea.hbm %s1734_s4, 1024 }
  0x68   : > { %s224_s6 = sshll.u32 %s1448_s14, 4  ;;  %p1348_p7 = scmp.ne.s32.totalorder %s1734_s4, %s1347_s7  ;;  %s225_s6 = int_to_ptr.vmem [resolvable:$true] %s224_s6 }
  0x69   : > { %p1351_p8 = scmp.lt.u32.totalorder %s1347_s7, %s1734_s4 }
  0x6b   : > { %p1353_p9 = pnand %p1351_p8, %p1348_p7 }
  0x6d   : > { %1356 = shalt.err (!%p1353_p9)  }
  0x6e   : > { %s1357_s26 = scalar_lea.vmem %s225_s6, 1024  ;;  %p1362_p13 = scmp.lt.s32.totalorder %s225_s6, %s225_s6 }
  0x6f   : > { %p1358_p12 = scmp.ne.s32.totalorder %s225_s6, %s1357_s26  ;;  %p1363_p1 = scmp.lt.s32.totalorder %s1357_s26, %s1357_s26 }
  0x71   : > { %p1364_p3 = por %p1363_p1, %p1362_p13 }
  0x73   : > { %p1365_p5 = pnand %p1364_p3, %p1358_p12 }
  0x75   : > { %1368 = shalt.err (!%p1365_p5)  }
  0x76   : > { %227 = dma.hbm_to_vmem [thread:$0]  %s1734_s4, 1024, %s225_s6, [#allocation11] }
  0x77   : > { %1421 = dma.done.wait [#allocation11], 1024 }
  0x78   : > { %1422 = vsyncadd [#allocation11], 4294966272 }
  0x79 PF: > { %s1650_s15 = sld [smem:[#allocation4 + %s1513_s0]] }
  0x7f   : > { %p998_p0 = scmp.eq.s32.totalorder %s1650_s15, 0 }
  0x80   : > { %v1255_v0 = vld [vmem:[%s1621_s13] sm:$0xff] (!%p998_p0)   ;;  %v1256_v1 = vld [vmem:[%s1621_s13 + $0x8] sm:$0xff] (!%p998_p0)   ;;  %v1257_v2 = vld [vmem:[%s1621_s13 + $0x10] sm:$0xff] (!%p998_p0)  }
  0x81   : > { %236 = sbr.rel (%p998_p0) target bundleno = 650 (0x28a), region = 53  ;;  %1080 = vmatprep.subr.bf16.mxu0 (!%p998_p0), %v1255_v0  ;;  %v1258_v3 = vld [vmem:[%s1621_s13 + $0x18] sm:$0xff] (!%p998_p0)   ;;  %v237_v4 = vld [vmem:[#allocation2] sm:$0xff] (!%p998_p0)  ;;  %v1260_v6 = vld [vmem:[%s1621_s13 + $0x28] sm:$0xff] (!%p998_p0)  }
  0x82   : > { %1081 = vmatpush3.bf16.msra.mxu0 (!%p998_p0), %v1255_v0  ;;  %1096 = vmatprep.mubr.bf16.mxu0 (!%p998_p0), %v237_v4  ;;  %v1259_v5 = vld [vmem:[%s1621_s13 + $0x20] sm:$0xff] (!%p998_p0)   ;;  %v1261_v7 = vld [vmem:[%s1621_s13 + $0x30] sm:$0xff] (!%p998_p0)   ;;  %v1262_v8 = vld [vmem:[%s1621_s13 + $0x38] sm:$0xff] (!%p998_p0)  }
  0x83   : > { %1082 = vmatprep.subr.bf16.mxu0 (!%p998_p0), %v1256_v1  ;;  %v238_v9 = vld [vmem:[#allocation2 + $0x8] sm:$0xff] (!%p998_p0)  ;;  %v239_v10 = vld [vmem:[#allocation2 + $0x10] sm:$0xff] (!%p998_p0)  ;;  %v240_v11 = vld [vmem:[#allocation2 + $0x18] sm:$0xff] (!%p998_p0) }
  0x84   : > { %v241_v12 = vld [vmem:[#allocation2 + $0x20] sm:$0xff] (!%p998_p0)  ;;  %v242_v13 = vld [vmem:[#allocation2 + $0x28] sm:$0xff] (!%p998_p0)  ;;  %v243_v14 = vld [vmem:[#allocation2 + $0x30] sm:$0xff] (!%p998_p0) }
  0x85   : > { %v244_v15 = vld [vmem:[#allocation2 + $0x38] sm:$0xff] (!%p998_p0)  ;;  %v1263_v16 = vld [vmem:[#allocation5] sm:$0xff] (!%p998_p0)   ;;  %v1264_v41 = vld [vmem:[#allocation5 + $0x8] sm:$0xff] (!%p998_p0)  }
  0x86   : > { %1083 = vmatpush3.bf16.msra.mxu0 (!%p998_p0), %v1256_v1  ;;  %1128 = vmatprep.mubr.bf16.mxu1 (!%p998_p0), %v1263_v16  ;;  %v1265_v42 = vld [vmem:[#allocation5 + $0x10] sm:$0xff] (!%p998_p0)   ;;  %v1266_v43 = vld [vmem:[#allocation5 + $0x18] sm:$0xff] (!%p998_p0)   ;;  %v1267_v44 = vld [vmem:[#allocation5 + $0x20] sm:$0xff] (!%p998_p0)  }
  0x87   : > { %1084 = vmatprep.subr.bf16.mxu0 (!%p998_p0), %v1257_v2  ;;  %v1268_v45 = vld [vmem:[#allocation5 + $0x28] sm:$0xff] (!%p998_p0)   ;;  %v1269_v46 = vld [vmem:[#allocation5 + $0x30] sm:$0xff] (!%p998_p0)   ;;  %v1270_v47 = vld [vmem:[#allocation5 + $0x38] sm:$0xff] (!%p998_p0)  }
  0x8a   : > { %1085 = vmatpush3.bf16.msra.mxu0 %v1257_v2 }
  0x8b   : > { %1086 = vmatprep.subr.bf16.mxu0 %v1258_v3 }
  0x8e   : > { %1087 = vmatpush3.bf16.msra.mxu0 %v1258_v3 }
  0x8f   : > { %1088 = vmatprep.subr.bf16.mxu0 %v1259_v5 }
  0x92   : > { %1089 = vmatpush3.bf16.msra.mxu0 %v1259_v5 }
  0x93   : > { %1090 = vmatprep.subr.bf16.mxu0 %v1260_v6 }
  0x96   : > { %1091 = vmatpush3.bf16.msra.mxu0 %v1260_v6 }
  0x97   : > { %1092 = vmatprep.subr.bf16.mxu0 %v1261_v7 }
  0x9a   : > { %1093 = vmatpush3.bf16.msra.mxu0 %v1261_v7 }
  0x9b   : > { %1094 = vmatprep.subr.bf16.mxu0 %v1262_v8 }
  0x9e   : > { %1095 = vmatpush3.bf16.msra.mxu0 %v1262_v8 }
  0xa1   : > { %1097 = vmatmul.mubr.bf16.vlgmr.msra.gmra.mrb[0].mxu0 %v238_v9 }
  0xa2   : > { %1100 = vmatprep.mubr.bf16.mxu0 %v239_v10 }
  0xa9   : > { %1101 = vmatmul.mubr.bf16.gmra.mrb[4].mxu0 %v240_v11 }
  0xaa   : > { %1104 = vmatprep.mubr.bf16.mxu0 %v241_v12 }
  0xb1   : > { %1105 = vmatmul.mubr.bf16.gmra.mrb[8].mxu0 %v242_v13 }
  0xb2   : > { %1108 = vmatprep.mubr.bf16.mxu0 %v243_v14 }
  0xb9   : > { %1109 = vmatmul.mubr.bf16.gmra.mrb[12].mxu0 %v244_v15 }
 0x174   : > { %v1098_v17 = vpop.f32.mrb[0].mxu0 }
 0x175   : > { %v343_v18 = vpop.f32.mrb[1].mxu0 }
 0x176   : > { %v1099_v19 = vpop.f32.mrb[2].mxu0 }
 0x177   : > { %v407_v20 = vpack.c.bf16 %v1099_v19, %v1098_v17  ;;  %v346_v21 = vpop.f32.mrb[3].mxu0 }
 0x178   : > { %v406_v22 = vpack.c.bf16 %v346_v21, %v343_v18 }
 0x17a   : > { %1112 = vmatprep.subr.bf16.mxu1 %v406_v22 }
 0x17b   : > { %1113 = vmatpush3.bf16.msra.mxu1 %v406_v22 }
 0x17c   : > { %v1102_v23 = vpop.f32.mrb[4].mxu0  ;;  %1114 = vmatprep.subr.bf16.mxu1 %v407_v20 }
 0x17d   : > { %v359_v24 = vpop.f32.mrb[5].mxu0 }
 0x17e   : > { %v1103_v25 = vpop.f32.mrb[6].mxu0 }
 0x17f   : > { %v409_v26 = vpack.c.bf16 %v1103_v25, %v1102_v23  ;;  %v362_v27 = vpop.f32.mrb[7].mxu0  ;;  %1115 = vmatpush3.bf16.msra.mxu1 %v407_v20 }
 0x180   : > { %v408_v28 = vpack.c.bf16 %v362_v27, %v359_v24 }
 0x182   : > { %1116 = vmatprep.subr.bf16.mxu1 %v408_v28 }
 0x183   : > { %1117 = vmatpush3.bf16.msra.mxu1 %v408_v28 }
 0x184   : > { %v1106_v29 = vpop.f32.mrb[8].mxu0  ;;  %1118 = vmatprep.subr.bf16.mxu1 %v409_v26 }
 0x185   : > { %v375_v30 = vpop.f32.mrb[9].mxu0 }
 0x186   : > { %v1107_v31 = vpop.f32.mrb[10].mxu0 }
 0x187   : > { %v411_v32 = vpack.c.bf16 %v1107_v31, %v1106_v29  ;;  %v378_v33 = vpop.f32.mrb[11].mxu0  ;;  %1119 = vmatpush3.bf16.msra.mxu1 %v409_v26 }
 0x188   : > { %v410_v34 = vpack.c.bf16 %v378_v33, %v375_v30 }
 0x18a   : > { %1120 = vmatprep.subr.bf16.mxu1 %v410_v34 }
 0x18b   : > { %1121 = vmatpush3.bf16.msra.mxu1 %v410_v34 }
 0x18c   : > { %v1110_v35 = vpop.f32.mrb[12].mxu0  ;;  %1122 = vmatprep.subr.bf16.mxu1 %v411_v32 }
 0x18d   : > { %v391_v36 = vpop.f32.mrb[13].mxu0 }
 0x18e   : > { %v1111_v37 = vpop.f32.mrb[14].mxu0 }
 0x18f   : > { %v413_v38 = vpack.c.bf16 %v1111_v37, %v1110_v35  ;;  %v394_v39 = vpop.f32.mrb[15].mxu0  ;;  %1123 = vmatpush3.bf16.msra.mxu1 %v411_v32 }
 0x190   : > { %v412_v40 = vpack.c.bf16 %v394_v39, %v391_v36 }
 0x192   : > { %1124 = vmatprep.subr.bf16.mxu1 %v412_v40 }
 0x193   : > { %1125 = vmatpush3.bf16.msra.mxu1 %v412_v40 }
 0x194   : > { %1126 = vmatprep.subr.bf16.mxu1 %v413_v38 }
 0x197   : > { %1127 = vmatpush3.bf16.msra.mxu1 %v413_v38 }
 0x19a   : > { %1129 = vmatmul.mubr.bf16.vlgmr.msra.gmra.mrb[0].mxu1 %v1264_v41 }
 0x19b   : > { %1132 = vmatprep.mubr.bf16.mxu1 %v1265_v42 }
 0x1a2   : > { %1133 = vmatmul.mubr.bf16.gmra.mrb[4].mxu1 %v1266_v43 }
 0x1a3   : > { %1136 = vmatprep.mubr.bf16.mxu1 %v1267_v44 }
 0x1aa   : > { %1137 = vmatmul.mubr.bf16.gmra.mrb[8].mxu1 %v1268_v45 }
 0x1ab   : > { %1140 = vmatprep.mubr.bf16.mxu1 %v1269_v46 }
 0x1b2   : > { %1141 = vmatmul.mubr.bf16.gmra.mrb[12].mxu1 %v1270_v47 }
 0x26d   : > { %v1130_v48 = vpop.f32.mrb[0].mxu1 }
 0x26e   : > { %577 = vst [vmem:[#allocation10 + $0x10] sm:$0xff] %v1130_v48  ;;  %v512_v49 = vpop.f32.mrb[1].mxu1 }
 0x26f   : > { %575 = vst [vmem:[#allocation10] sm:$0xff] %v512_v49  ;;  %v1131_v50 = vpop.f32.mrb[2].mxu1 }
 0x270   : > { %578 = vst [vmem:[#allocation10 + $0x18] sm:$0xff] %v1131_v50  ;;  %v515_v51 = vpop.f32.mrb[3].mxu1 }
 0x271   : > { %576 = vst [vmem:[#allocation10 + $0x8] sm:$0xff] %v515_v51 }
 0x275   : > { %v1134_v52 = vpop.f32.mrb[4].mxu1 }
 0x276   : > { %581 = vst [vmem:[#allocation10 + $0x30] sm:$0xff] %v1134_v52  ;;  %v528_v53 = vpop.f32.mrb[5].mxu1 }
 0x277   : > { %579 = vst [vmem:[#allocation10 + $0x20] sm:$0xff] %v528_v53  ;;  %v1135_v54 = vpop.f32.mrb[6].mxu1 }
 0x278   : > { %582 = vst [vmem:[#allocation10 + $0x38] sm:$0xff] %v1135_v54  ;;  %v531_v55 = vpop.f32.mrb[7].mxu1 }
 0x279   : > { %580 = vst [vmem:[#allocation10 + $0x28] sm:$0xff] %v531_v55 }
 0x27d   : > { %v1138_v56 = vpop.f32.mrb[8].mxu1 }
 0x27e   : > { %585 = vst [vmem:[#allocation10 + $0x50] sm:$0xff] %v1138_v56  ;;  %v544_v57 = vpop.f32.mrb[9].mxu1 }
 0x27f   : > { %583 = vst [vmem:[#allocation10 + $0x40] sm:$0xff] %v544_v57  ;;  %v1139_v58 = vpop.f32.mrb[10].mxu1 }
 0x280   : > { %586 = vst [vmem:[#allocation10 + $0x58] sm:$0xff] %v1139_v58  ;;  %v547_v59 = vpop.f32.mrb[11].mxu1 }
 0x281   : > { %584 = vst [vmem:[#allocation10 + $0x48] sm:$0xff] %v547_v59 }
 0x285   : > { %v1142_v60 = vpop.f32.mrb[12].mxu1 }
 0x286   : > { %589 = vst [vmem:[#allocation10 + $0x70] sm:$0xff] %v1142_v60  ;;  %v560_v61 = vpop.f32.mrb[13].mxu1 }
 0x287   : > { %587 = vst [vmem:[#allocation10 + $0x60] sm:$0xff] %v560_v61  ;;  %v1143_v62 = vpop.f32.mrb[14].mxu1 }
 0x288   : > { %590 = vst [vmem:[#allocation10 + $0x78] sm:$0xff] %v1143_v62  ;;  %v563_v63 = vpop.f32.mrb[15].mxu1 }
 0x289   : > { %588 = vst [vmem:[#allocation10 + $0x68] sm:$0xff] %v563_v63 }
 0x28a PF: > { %p1015_p2 = scmp.ne.s32.totalorder %s1650_s15, 0 }
 0x28b   : > { %v1271_v0 = vld [vmem:[%s1621_s13] sm:$0xff] (!%p1015_p2)   ;;  %v1272_v1 = vld [vmem:[%s1621_s13 + $0x8] sm:$0xff] (!%p1015_p2)   ;;  %v1273_v2 = vld [vmem:[%s1621_s13 + $0x10] sm:$0xff] (!%p1015_p2)  }
 0x28c   : > { %594 = sbr.rel (%p1015_p2) target bundleno = 908 (0x38c), region = 57  ;;  %1144 = vmatprep.subr.bf16.mxu0 (!%p1015_p2), %v1271_v0  ;;  %1176 = vmatprep.subr.bf16.mxu1 (!%p1015_p2), %v1271_v0  ;;  %v1274_v3 = vld [vmem:[%s1621_s13 + $0x18] sm:$0xff] (!%p1015_p2)   ;;  %v595_v4 = vld [vmem:[#allocation2] sm:$0xff] (!%p1015_p2)  ;;  %v1276_v7 = vld [vmem:[%s1621_s13 + $0x28] sm:$0xff] (!%p1015_p2)  }
 0x28d   : > { %1145 = vmatpush3.bf16.msra.mxu0 (!%p1015_p2), %v1271_v0  ;;  %1184 = vmatpush3.bf16.msra.mxu1 (!%p1015_p2), %v1271_v0  ;;  %v599_v5 = vld [vmem:[#allocation2 + $0x20] sm:$0xff] (!%p1015_p2)  ;;  %v1277_v8 = vld [vmem:[%s1621_s13 + $0x30] sm:$0xff] (!%p1015_p2)   ;;  %v1278_v9 = vld [vmem:[%s1621_s13 + $0x38] sm:$0xff] (!%p1015_p2)  }
 0x28e   : > { %1146 = vmatprep.subr.bf16.mxu0 (!%p1015_p2), %v1272_v1  ;;  %1177 = vmatprep.subr.bf16.mxu1 (!%p1015_p2), %v1272_v1  ;;  %v1275_v6 = vld [vmem:[%s1621_s13 + $0x20] sm:$0xff] (!%p1015_p2)   ;;  %v596_v10 = vld [vmem:[#allocation2 + $0x8] sm:$0xff] (!%p1015_p2)  ;;  %v597_v12 = vld [vmem:[#allocation2 + $0x10] sm:$0xff] (!%p1015_p2) }
 0x28f   : > { %1160 = vmatprep.mubr.bf16.mxu0 (!%p1015_p2), %v595_v4  ;;  %1168 = vmatprep.mubr.bf16.mxu1 (!%p1015_p2), %v599_v5  ;;  %v600_v11 = vld [vmem:[#allocation2 + $0x28] sm:$0xff] (!%p1015_p2)  ;;  %v601_v13 = vld [vmem:[#allocation2 + $0x30] sm:$0xff] (!%p1015_p2)  ;;  %v598_v14 = vld [vmem:[#allocation2 + $0x18] sm:$0xff] (!%p1015_p2) }
 0x290   : > { %v602_v15 = vld [vmem:[#allocation2 + $0x38] sm:$0xff] (!%p1015_p2) }
 0x291   : > { %1147 = vmatpush3.bf16.msra.mxu0 (!%p1015_p2), %v1272_v1  ;;  %1185 = vmatpush3.bf16.msra.mxu1 (!%p1015_p2), %v1272_v1 }
 0x292   : > { %1148 = vmatprep.subr.bf16.mxu0 (!%p1015_p2), %v1273_v2  ;;  %1178 = vmatprep.subr.bf16.mxu1 (!%p1015_p2), %v1273_v2 }
 0x295   : > { %1149 = vmatpush3.bf16.msra.mxu0 %v1273_v2  ;;  %1186 = vmatpush3.bf16.msra.mxu1 %v1273_v2 }
 0x296   : > { %1150 = vmatprep.subr.bf16.mxu0 %v1274_v3  ;;  %1179 = vmatprep.subr.bf16.mxu1 %v1274_v3 }
 0x299   : > { %1151 = vmatpush3.bf16.msra.mxu0 %v1274_v3  ;;  %1187 = vmatpush3.bf16.msra.mxu1 %v1274_v3 }
 0x29a   : > { %1152 = vmatprep.subr.bf16.mxu0 %v1275_v6  ;;  %1180 = vmatprep.subr.bf16.mxu1 %v1275_v6 }
 0x29d   : > { %1153 = vmatpush3.bf16.msra.mxu0 %v1275_v6  ;;  %1188 = vmatpush3.bf16.msra.mxu1 %v1275_v6 }
 0x29e   : > { %1154 = vmatprep.subr.bf16.mxu0 %v1276_v7  ;;  %1181 = vmatprep.subr.bf16.mxu1 %v1276_v7 }
 0x2a1   : > { %1155 = vmatpush3.bf16.msra.mxu0 %v1276_v7  ;;  %1189 = vmatpush3.bf16.msra.mxu1 %v1276_v7 }
 0x2a2   : > { %1156 = vmatprep.subr.bf16.mxu0 %v1277_v8  ;;  %1182 = vmatprep.subr.bf16.mxu1 %v1277_v8 }
 0x2a5   : > { %1157 = vmatpush3.bf16.msra.mxu0 %v1277_v8  ;;  %1190 = vmatpush3.bf16.msra.mxu1 %v1277_v8 }
 0x2a6   : > { %1158 = vmatprep.subr.bf16.mxu0 %v1278_v9  ;;  %1183 = vmatprep.subr.bf16.mxu1 %v1278_v9 }
 0x2a9   : > { %1159 = vmatpush3.bf16.msra.mxu0 %v1278_v9  ;;  %1191 = vmatpush3.bf16.msra.mxu1 %v1278_v9 }
 0x2ac   : > { %1161 = vmatmul.mubr.bf16.vlgmr.msra.gmra.mrb[0].mxu0 %v596_v10  ;;  %1169 = vmatmul.mubr.bf16.vlgmr.msra.gmra.mrb[0].mxu1 %v600_v11 }
 0x2ad   : > { %1164 = vmatprep.mubr.bf16.mxu0 %v597_v12  ;;  %1172 = vmatprep.mubr.bf16.mxu1 %v601_v13 }
 0x2b4   : > { %1165 = vmatmul.mubr.bf16.gmra.mrb[4].mxu0 %v598_v14  ;;  %1173 = vmatmul.mubr.bf16.gmra.mrb[4].mxu1 %v602_v15 }
 0x37f   : > { %v1162_v16 = vpop.f32.mrb[0].mxu0  ;;  %v1170_v17 = vpop.f32.mrb[0].mxu1 }
 0x380   : > { %766 = vst [vmem:[#allocation10 + $0x10] sm:$0xff] %v1162_v16  ;;  %774 = vst [vmem:[#allocation10 + $0x50] sm:$0xff] %v1170_v17  ;;  %v701_v18 = vpop.f32.mrb[1].mxu0  ;;  %v733_v19 = vpop.f32.mrb[1].mxu1 }
 0x381   : > { %764 = vst [vmem:[#allocation10] sm:$0xff] %v701_v18  ;;  %772 = vst [vmem:[#allocation10 + $0x40] sm:$0xff] %v733_v19  ;;  %v1163_v20 = vpop.f32.mrb[2].mxu0  ;;  %v1171_v21 = vpop.f32.mrb[2].mxu1 }
 0x382   : > { %767 = vst [vmem:[#allocation10 + $0x18] sm:$0xff] %v1163_v20  ;;  %775 = vst [vmem:[#allocation10 + $0x58] sm:$0xff] %v1171_v21  ;;  %v704_v22 = vpop.f32.mrb[3].mxu0  ;;  %v736_v23 = vpop.f32.mrb[3].mxu1 }
 0x383   : > { %765 = vst [vmem:[#allocation10 + $0x8] sm:$0xff] %v704_v22  ;;  %773 = vst [vmem:[#allocation10 + $0x48] sm:$0xff] %v736_v23 }
 0x387   : > { %v1166_v24 = vpop.f32.mrb[4].mxu0  ;;  %v1174_v25 = vpop.f32.mrb[4].mxu1 }
 0x388   : > { %770 = vst [vmem:[#allocation10 + $0x30] sm:$0xff] %v1166_v24  ;;  %778 = vst [vmem:[#allocation10 + $0x70] sm:$0xff] %v1174_v25  ;;  %v717_v26 = vpop.f32.mrb[5].mxu0  ;;  %v749_v27 = vpop.f32.mrb[5].mxu1 }
 0x389   : > { %768 = vst [vmem:[#allocation10 + $0x20] sm:$0xff] %v717_v26  ;;  %776 = vst [vmem:[#allocation10 + $0x60] sm:$0xff] %v749_v27  ;;  %v1167_v28 = vpop.f32.mrb[6].mxu0  ;;  %v1175_v29 = vpop.f32.mrb[6].mxu1 }
 0x38a   : > { %771 = vst [vmem:[#allocation10 + $0x38] sm:$0xff] %v1167_v28  ;;  %779 = vst [vmem:[#allocation10 + $0x78] sm:$0xff] %v1175_v29  ;;  %v720_v30 = vpop.f32.mrb[7].mxu0  ;;  %v752_v31 = vpop.f32.mrb[7].mxu1 }
 0x38b   : > { %769 = vst [vmem:[#allocation10 + $0x28] sm:$0xff] %v720_v30  ;;  %777 = vst [vmem:[#allocation10 + $0x68] sm:$0xff] %v752_v31 }
 0x38c PF: > { %v780_v32 = vld [vmem:[#allocation10] sm:$0xff]  ;;  %v781_v33 = vld [vmem:[#allocation10 + $0x8] sm:$0xff]  ;;  %v782_v34 = vld [vmem:[#allocation10 + $0x10] sm:$0xff]  ;;  %p1025_p6 = scmp.eq.s32.totalorder %s1513_s0, 3 }
 0x38d   : > { %v783_v35 = vld [vmem:[#allocation10 + $0x18] sm:$0xff]  ;;  %v788_v40 = vld [vmem:[#allocation10 + $0x40] sm:$0xff]  ;;  %v789_v41 = vld [vmem:[#allocation10 + $0x48] sm:$0xff] }
 0x38e   : > { %v790_v42 = vld [vmem:[#allocation10 + $0x50] sm:$0xff]  ;;  %v791_v43 = vld [vmem:[#allocation10 + $0x58] sm:$0xff] }
 0x38f   : > { %v786_v38 = vld [vmem:[#allocation10 + $0x30] sm:$0xff]  ;;  %v1024_v45 = vld [vmem:[%s211_s11] ss:$0 sm:$0xff] }
 0x390   : > { %v784_v36 = vld [vmem:[#allocation10 + $0x20] sm:$0xff]  ;;  %v794_v47 = vld [vmem:[#allocation10 + $0x70] sm:$0xff]  ;;  %v803_v49 = vadd.f32 %v1024_v45, %v780_v32  ;;  %v804_v50 = vadd.f32 %v1024_v45, %v781_v33  ;;  %v805_v51 = vadd.f32 %v1024_v45, %v782_v34  ;;  %v806_v52 = vadd.f32 %v1024_v45, %v783_v35 }
 0x391   : > { %v787_v39 = vld [vmem:[#allocation10 + $0x38] sm:$0xff]  ;;  %v792_v44 = vld [vmem:[#allocation10 + $0x60] sm:$0xff]  ;;  %v807_v53 = vadd.f32 %v1024_v45, %v784_v36  ;;  %v809_v55 = vadd.f32 %v1024_v45, %v786_v38  ;;  %v811_v57 = vadd.f32 %v1024_v45, %v788_v40  ;;  %v812_v58 = vadd.f32 %v1024_v45, %v789_v41 }
 0x392   : > { %v785_v37 = vld [vmem:[#allocation10 + $0x28] sm:$0xff]  ;;  %v795_v48 = vld [vmem:[#allocation10 + $0x78] sm:$0xff]  ;;  %v810_v56 = vadd.f32 %v1024_v45, %v787_v39  ;;  %v813_v59 = vadd.f32 %v1024_v45, %v790_v42  ;;  %v814_v60 = vadd.f32 %v1024_v45, %v791_v43  ;;  %v815_v61 = vadd.f32 %v1024_v45, %v792_v44 }
 0x393   : > { %v793_v46 = vld [vmem:[#allocation10 + $0x68] sm:$0xff]  ;;  %v808_v54 = vadd.f32 %v1024_v45, %v785_v37  ;;  %v817_v63 = vadd.f32 %v1024_v45, %v794_v47  ;;  %v818_v0 = vadd.f32 %v1024_v45, %v795_v48  ;;  %vm819_vm0 = vcmp.ge.f32.partialorder %v803_v49, 0.0 }
 0x394   : > { %v816_v62 = vadd.f32 %v1024_v45, %v793_v46  ;;  %vm820_vm1 = vcmp.ge.f32.partialorder %v804_v50, 0.0  ;;  %vm821_vm2 = vcmp.ge.f32.partialorder %v805_v51, 0.0  ;;  %vm822_vm3 = vcmp.ge.f32.partialorder %v806_v52, 0.0 }
 0x395   : > { %vm823_vm4 = vcmp.ge.f32.partialorder %v807_v53, 0.0  ;;  %vm824_vm5 = vcmp.ge.f32.partialorder %v808_v54, 0.0  ;;  %vm825_vm6 = vcmp.ge.f32.partialorder %v809_v55, 0.0  ;;  %vm826_vm7 = vcmp.ge.f32.partialorder %v810_v56, 0.0 }
 0x396   : > { %vm827_vm8 = vcmp.ge.f32.partialorder %v811_v57, 0.0  ;;  %vm828_vm9 = vcmp.ge.f32.partialorder %v812_v58, 0.0  ;;  %vm829_vm10 = vcmp.ge.f32.partialorder %v813_v59, 0.0  ;;  %vm830_vm11 = vcmp.ge.f32.partialorder %v814_v60, 0.0 }
 0x397   : > { %vm831_vm12 = vcmp.ge.f32.partialorder %v815_v61, 0.0  ;;  %vm832_vm13 = vcmp.ge.f32.partialorder %v816_v62, 0.0  ;;  %vm833_vm14 = vcmp.ge.f32.partialorder %v817_v63, 0.0  ;;  %vm834_vm15 = vcmp.ge.f32.partialorder %v818_v0, 0.0 }
 0x398   : > { %v835_v1 = vmul.f32 0.01, %v803_v49  ;;  %v836_v2 = vmul.f32 0.01, %v804_v50  ;;  %v837_v3 = vmul.f32 0.01, %v805_v51 }
 0x399   : > { %v838_v4 = vmul.f32 0.01, %v806_v52  ;;  %v839_v5 = vmul.f32 0.01, %v807_v53  ;;  %v840_v6 = vmul.f32 0.01, %v808_v54 }
 0x39a   : > { %v841_v7 = vmul.f32 0.01, %v809_v55  ;;  %v842_v8 = vmul.f32 0.01, %v810_v56  ;;  %v843_v9 = vmul.f32 0.01, %v811_v57  ;;  %v851_v10 = vsel %vm819_vm0, %v803_v49, %v835_v1 }
 0x39b   : > { %v844_v11 = vmul.f32 0.01, %v812_v58  ;;  %v845_v12 = vmul.f32 0.01, %v813_v59  ;;  %v846_v13 = vmul.f32 0.01, %v814_v60  ;;  %v852_v14 = vsel %vm820_vm1, %v804_v50, %v836_v2 }
 0x39c   : > { %v847_v15 = vmul.f32 0.01, %v815_v61  ;;  %v848_v16 = vmul.f32 0.01, %v816_v62  ;;  %v849_v17 = vmul.f32 0.01, %v817_v63  ;;  %v853_v18 = vsel %vm821_vm2, %v805_v51, %v837_v3 }
 0x39d   : > { %v850_v19 = vmul.f32 0.01, %v818_v0  ;;  %v854_v20 = vsel %vm822_vm3, %v806_v52, %v838_v4  ;;  %v855_v21 = vsel %vm823_vm4, %v807_v53, %v839_v5  ;;  %v856_v22 = vsel %vm824_vm5, %v808_v54, %v840_v6  ;;  %870 = sbr.rel (%p1025_p6) target bundleno = 934 (0x3a6), region = 61 }
 0x39e   : > { %v857_v23 = vsel %vm825_vm6, %v809_v55, %v841_v7  ;;  %v858_v24 = vsel %vm826_vm7, %v810_v56, %v842_v8  ;;  %v859_v25 = vsel %vm827_vm8, %v811_v57, %v843_v9  ;;  %v860_v26 = vsel %vm828_vm9, %v812_v58, %v844_v11 }
 0x39f   : > { %v861_v27 = vsel %vm829_vm10, %v813_v59, %v845_v12  ;;  %v862_v28 = vsel %vm830_vm11, %v814_v60, %v846_v13  ;;  %v863_v29 = vsel %vm831_vm12, %v815_v61, %v847_v15  ;;  %v864_v30 = vsel %vm832_vm13, %v816_v62, %v848_v16 }
 0x3a0   : > { %v865_v31 = vsel %vm833_vm14, %v817_v63, %v849_v17  ;;  %v866_v32 = vsel %vm834_vm15, %v818_v0, %v850_v19  ;;  %v871_v33 = vpack.c.bf16 (!%p1025_p6), %v852_v14, %v851_v10  ;;  %v872_v34 = vpack.c.bf16 (!%p1025_p6), %v854_v20, %v853_v18 }
 0x3a1   : > { %v873_v35 = vpack.c.bf16 (!%p1025_p6), %v856_v22, %v855_v21  ;;  %v874_v36 = vpack.c.bf16 (!%p1025_p6), %v858_v24, %v857_v23  ;;  %v875_v37 = vpack.c.bf16 (!%p1025_p6), %v860_v26, %v859_v25  ;;  %v876_v38 = vpack.c.bf16 (!%p1025_p6), %v862_v28, %v861_v27 }
 0x3a2   : > { %v877_v39 = vpack.c.bf16 (!%p1025_p6), %v864_v30, %v863_v29  ;;  %v878_v40 = vpack.c.bf16 (!%p1025_p6), %v866_v32, %v865_v31  ;;  %879 = vst [vmem:[#allocation2] sm:$0xff] (!%p1025_p6), %v871_v33  ;;  %880 = vst [vmem:[#allocation2 + $0x8] sm:$0xff] (!%p1025_p6), %v872_v34 }
 0x3a3   : > { %881 = vst [vmem:[#allocation2 + $0x10] sm:$0xff] (!%p1025_p6), %v873_v35  ;;  %882 = vst [vmem:[#allocation2 + $0x18] sm:$0xff] (!%p1025_p6), %v874_v36 }
 0x3a4   : > { %883 = vst [vmem:[#allocation2 + $0x20] sm:$0xff] %v875_v37  ;;  %884 = vst [vmem:[#allocation2 + $0x28] sm:$0xff] %v876_v38 }
 0x3a5   : > { %885 = vst [vmem:[#allocation2 + $0x30] sm:$0xff] %v877_v39  ;;  %886 = vst [vmem:[#allocation2 + $0x38] sm:$0xff] %v878_v40 }
 0x3a6 PF: > { %p1026_p10 = scmp.ne.s32.totalorder %s1513_s0, 3 }
 0x3a7   : > { %891 = vst [vmem:[#allocation10] sm:$0xff] (!%p1026_p10), %v851_v10  ;;  %892 = vst [vmem:[#allocation10 + $0x8] sm:$0xff] (!%p1026_p10), %v852_v14 }
 0x3a8   : > { %890 = sbr.rel (%p1026_p10) target bundleno = 943 (0x3af), region = 65  ;;  %893 = vst [vmem:[#allocation10 + $0x10] sm:$0xff] (!%p1026_p10), %v853_v18  ;;  %894 = vst [vmem:[#allocation10 + $0x18] sm:$0xff] (!%p1026_p10), %v854_v20 }
 0x3a9   : > { %895 = vst [vmem:[#allocation10 + $0x20] sm:$0xff] (!%p1026_p10), %v855_v21  ;;  %896 = vst [vmem:[#allocation10 + $0x28] sm:$0xff] (!%p1026_p10), %v856_v22 }
 0x3aa   : > { %897 = vst [vmem:[#allocation10 + $0x30] sm:$0xff] (!%p1026_p10), %v857_v23  ;;  %898 = vst [vmem:[#allocation10 + $0x38] sm:$0xff] (!%p1026_p10), %v858_v24 }
 0x3ab   : > { %899 = vst [vmem:[#allocation10 + $0x40] sm:$0xff] (!%p1026_p10), %v859_v25  ;;  %900 = vst [vmem:[#allocation10 + $0x48] sm:$0xff] (!%p1026_p10), %v860_v26 }
 0x3ac   : > { %901 = vst [vmem:[#allocation10 + $0x50] sm:$0xff] (!%p1026_p10), %v861_v27  ;;  %902 = vst [vmem:[#allocation10 + $0x58] sm:$0xff] (!%p1026_p10), %v862_v28 }
 0x3ad   : > { %903 = vst [vmem:[#allocation10 + $0x60] sm:$0xff] (!%p1026_p10), %v863_v29  ;;  %904 = vst [vmem:[#allocation10 + $0x68] sm:$0xff] (!%p1026_p10), %v864_v30 }
 0x3ae   : > { %905 = vst [vmem:[#allocation10 + $0x70] sm:$0xff] (!%p1026_p10), %v865_v31  ;;  %906 = vst [vmem:[#allocation10 + $0x78] sm:$0xff] (!%p1026_p10), %v866_v32 }
 0x3af PF: > { %s1449_s10 = smov [#allocation10]  }
 0x3b0   : > { %s913_s13 = sshll.u32 %s1449_s10, 4  ;;  %s914_s13 = int_to_ptr.vmem [resolvable:$true] %s913_s13 }
 0x3b1   : > { %s1369_s8 = scalar_lea.vmem %s914_s13, 2048  ;;  %p1376_p8 = scmp.lt.s32.totalorder %s914_s13, %s914_s13 }
 0x3b2   : > { %p1370_p11 = scmp.ne.s32.totalorder %s914_s13, %s1369_s8  ;;  %p1377_p9 = scmp.lt.s32.totalorder %s1369_s8, %s1369_s8 }
 0x3b4   : > { %p1371_p4 = pnand %p1370_p11, %p1025_p6  ;;  %p1378_p12 = por %p1377_p9, %p1376_p8 }
 0x3b6   : > { %p1372_p7 = pneg %p1371_p4 }
 0x3b8   : > { %p1379_p13 = pnand %p1378_p12, %p1372_p7 }
 0x3ba   : > { %1382 = shalt.err (!%p1379_p13)
}
 0x3bb   : > { %s1383_s11 = scalar_lea.hbm %s1735_s5, 2048 }
 0x3bc   : > { %p1384_p1 = scmp.ne.s32.totalorder %s1735_s5, %s1383_s11  ;;  %p1389_p0 = scmp.lt.u32.totalorder %s1383_s11, %s1735_s5 }
 0x3be   : > { %p1385_p3 = pnand %p1384_p1, %p1025_p6 }
 0x3c0   : > { %p1386_p5 = pneg %p1385_p3 }
 0x3c2   : > { %p1391_p2 = pnand %p1389_p0, %p1386_p5 }
 0x3c4   : > { %1394 = shalt.err (!%p1391_p2)
}
 0x3c5   : > { %s1450_s7 = smov 128   ;;  %s1451_s20 = smov 8  }
 0x3c6   : > { %1199 = dma.vmem_to_hbm [thread:$0]  (%p1025_p6), %s914_s13, 2048, %s1735_s5, [#allocation7], %s1450_s7, %s1450_s7, %s1451_s20  }
 0x3c7   : > { %1424 = dma.done.wait (%p1025_p6), [#allocation7], 2048  }
 0x3c8   : > { %1426 = vsyncadd (%p1025_p6), [#allocation7], 4294965248 }
 0x3c9 PF: > { %p21_p10 = scmp.ge.s32.totalorder %s1539_s12, 6   ;;  %s1748_s28 = smov %s1433_s29 }
 0x3ca   : > { %s1749_s29 = smov %s1437_s30  ;;  %s1750_s30 = smov %s1568_s27 }
 0x3cb   : > { %s1751_s6 = smov %s1539_s12  ;;  %23 = sbr.rel (!%p21_p10) target bundleno = 17 (0x11), region = 102 }
 0x3d2   :  { %929 = vsyncpa [#allocation6], 1 }
 0x3d3   :  { %931 = vsyncpa [#allocation6 + $0x1], 1 }
 0x3d4   :  { %932 = vsyncpa [#allocation9], 1 }
 0x3d5   :  { %934 = vsyncpa [#allocation9 + $0x1], 1 }
 0x3d6   :  { %935 = vsyncpa [#allocation7], 1 }
 0x3d7   :  { %937 = vsyncpa [#allocation7 + $0x1], 1 }

</bundles_post_ra>
